<compile_context>
chip_gen: v7x
topology: tpu7x:2x2x1
jax: 0.10.0
libtpu: 0.0.40
codegen_flags: <defaults>
</compile_context>

<pallas_src>
import functools

import jax
import jax.numpy as jnp
from jax import lax
from jax.experimental import pallas as pl
from jax.experimental.pallas import tpu as pltpu

_LANE = 128


def _crf_forward_kernel(tile_max_ref, lens_ref, logits_ref, exp_trans_ref,
                        trans_max_ref, trans_stop_ref, out_ref, alpha_ref, *,
                        start_idx, time_block, use_mxu):
    """Grid = (batch_tiles, time_blocks); one grid step == `time_block` timesteps.

    tile_max_ref   : (n_bt,)       int32  SMEM (scalar prefetch: per-tile max len)
    lens_ref       : (1, TB)       int32  VMEM (sequence lengths, batch on lanes)
    logits_ref     : (T, NL, TB)   any    VMEM (emissions for this time block)
    exp_trans_ref  : (NL, NL)      f32    VMEM (exp(transitions - row_max))
    trans_max_ref  : (NL, 1)       f32    VMEM (row max of transitions)
    trans_stop_ref : (NL, 1)       f32    VMEM (transitions[stop_idx, :] as column)
    out_ref        : (1, TB)       f32    VMEM (log partition, written at last block)
    alpha_ref      : (NL, TB)      f32    VMEM scratch carried across time blocks
    """
    bi = pl.program_id(0)
    ti = pl.program_id(1)
    n_t = pl.num_programs(1)
    NL, TB = alpha_ref.shape

    # --- init alpha at the first time block: -10000 everywhere, 0 at start_idx ---
    @pl.when(ti == 0)
    def _():
        row = lax.broadcasted_iota(jnp.int32, (NL, TB), 0)
        alpha_ref[...] = jnp.where(row == start_idx,
                                   jnp.float32(0.0),
                                   jnp.float32(-10000.0))

    base_t = ti * time_block
    tile_max = tile_max_ref[bi]

    # --- run the recursion only for time blocks active for THIS batch tile ---
    @pl.when(base_t < tile_max)
    def _():
        lens = lens_ref[...]                                   # (1, TB)
        exp_trans = exp_trans_ref[...]                         # (NL, NL)
        # Hoist broadcasts out of the time loop (JAX does not CSE them).
        tmax_b = jnp.broadcast_to(trans_max_ref[...], (NL, TB))
        if not use_mxu:
            exp_trans_b = jnp.broadcast_to(exp_trans[:, :, None], (NL, NL, TB))

        def step(s, alpha):
            # alpha: (NL, TB), batch on lanes.
            # logsumexp_j(trans[i,j] + alpha[j,b]) + logit[i,b]
            #   = log(sum_j exp(trans[i,j]-tmax[i]) * exp(alpha[j,b]-m[b]))
            #     + tmax[i] + m[b] + logit[i,b]
            logit = logits_ref[s].astype(jnp.float32)          # (NL, TB)
            m = jnp.max(alpha, axis=0, keepdims=True)          # (1, TB)
            p = jnp.exp(alpha - m)                             # (NL, TB), EUP
            if use_mxu:
                acc = jnp.dot(exp_trans, p,
                              preferred_element_type=jnp.float32)      # MXU
            else:
                acc = jnp.sum(exp_trans_b * p[None, :, :], axis=1)     # VPU+XLU
            alpha_nxt = jnp.log(acc) + tmax_b + (m + logit)    # (NL, TB)
            t = base_t + s
            return jnp.where(lens > t, alpha_nxt, alpha)

        unroll = True if time_block <= 32 else 8
        alpha_ref[...] = lax.fori_loop(0, time_block, step, alpha_ref[...],
                                       unroll=unroll)

    # --- finalize at the last time block (out block index is constant in ti) ---
    @pl.when(ti == n_t - 1)
    def _():
        a = alpha_ref[...] + trans_stop_ref[...]               # (NL, TB)
        m = jnp.max(a, axis=0, keepdims=True)                  # (1, TB)
        out_ref[...] = m + jnp.log(jnp.sum(jnp.exp(a - m), axis=0, keepdims=True))


def crf_forward(logits, lens, transitions, *, time_block=256):
    """CRF log partition function (matches PyTorch CRF.forward).

    logits      : (B, S, NL) float (f32 or bf16; bf16 stays bf16 through DMA)
    lens        : (B,)       int
    transitions : (NL, NL)   float
    returns     : (B,)       float32
    """
    B, S, NL = logits.shape
    start_idx = NL - 2
    stop_idx = NL - 1

    # Batch tiling: pad only to the next multiple of 128 lanes, then carry up
    # to 4 independent 128-lane chains per grid step (ILP across the serial
    # time recursion).  TB must divide B_pad.
    B_pad = ((B + _LANE - 1) // _LANE) * _LANE
    nb = B_pad // _LANE
    tb_mult = max(d for d in (4, 3, 2, 1) if nb % d == 0)
    TB = _LANE * tb_mult
    n_bt = B_pad // TB

    # Time blocking sized so the double-buffered logits block stays well under
    # the v7x 32 MiB scoped-VMEM default (also fine on v5e/v6e).
    itemsize = jnp.dtype(logits.dtype).itemsize
    vmem_budget = 8 * 1024 * 1024
    max_t = max(1, vmem_budget // (2 * NL * TB * itemsize))
    T = max(1, min(time_block, S, max_t))
    S_pad = ((S + T - 1) // T) * T
    n_tt = S_pad // T

    # Time-major, batch-on-lanes layout: (S_pad, NL, B_pad).  Input dtype kept.
    logits_t = jnp.pad(jnp.transpose(logits, (1, 2, 0)),
                       ((0, S_pad - S), (0, 0), (0, B_pad - B)))

    # Padded batch lanes get lens = 0 -> never updated, sliced off at the end.
    lens_i32 = lens.astype(jnp.int32)
    lens_p = jnp.pad(lens_i32, (0, B_pad - B)).reshape(1, B_pad)
    # Per-batch-tile max length (scalar prefetch) -> per-tile time-block gating.
    tile_max = jnp.max(lens_p.reshape(n_bt, TB), axis=1).astype(jnp.int32)

    trans = transitions.astype(jnp.float32)
    trans_max = jnp.max(trans, axis=1, keepdims=True)        # (NL, 1)
    exp_trans = jnp.exp(trans - trans_max)                   # (NL, NL), in (0, 1]
    trans_stop = trans[stop_idx, :].reshape(NL, 1)

    # Small label sets: exact-f32 VPU contraction (contraction cost is trivial,
    # EUP savings identical).  Large label sets: route contraction to the MXU.
    use_mxu = NL >= 32

    kernel = functools.partial(_crf_forward_kernel, start_idx=start_idx,
                               time_block=T, use_mxu=use_mxu)

    out = pl.pallas_call(
        kernel,
        out_shape=jax.ShapeDtypeStruct((1, B_pad), jnp.float32),
        grid_spec=pltpu.PrefetchScalarGridSpec(
            num_scalar_prefetch=1,
            grid=(n_bt, n_tt),
            in_specs=[
                pl.BlockSpec((1, TB), lambda bi, ti, tm: (0, bi)),          # lens
                pl.BlockSpec((T, NL, TB), lambda bi, ti, tm: (ti, 0, bi)),  # logits
                pl.BlockSpec((NL, NL), lambda bi, ti, tm: (0, 0)),          # exp_trans
                pl.BlockSpec((NL, 1), lambda bi, ti, tm: (0, 0)),           # trans_max
                pl.BlockSpec((NL, 1), lambda bi, ti, tm: (0, 0)),           # trans[stop]
            ],
            out_specs=pl.BlockSpec((1, TB), lambda bi, ti, tm: (0, bi)),
            scratch_shapes=[pltpu.VMEM((NL, TB), jnp.float32)],
        ),
        compiler_params=pltpu.CompilerParams(
            dimension_semantics=("parallel", "arbitrary")),
    )(tile_max, lens_p, logits_t, exp_trans, trans_max, trans_stop)
    return out[0, :B]


def crf_forward_ref(logits, lens, transitions):
    """Pure-JAX reference mirroring the PyTorch CRF.forward semantics."""
    B, S, NL = logits.shape
    start_idx, stop_idx = NL - 2, NL - 1
    alpha = jnp.full((B, NL), -10000.0, jnp.float32).at[:, start_idx].set(0.0)
    c_lens = lens.astype(jnp.int32)
    for t in range(S):
        logit = logits[:, t, :].astype(jnp.float32)
        mat = transitions[None, :, :] + alpha[:, None, :] + logit[:, :, None]
        m = jnp.max(mat, axis=2)
        alpha_nxt = m + jnp.log(jnp.sum(jnp.exp(mat - m[..., None]), axis=2))
        mask = (c_lens > 0).astype(jnp.float32)[:, None]
        alpha = mask * alpha_nxt + (1.0 - mask) * alpha
        c_lens = c_lens - 1
    alpha = alpha + transitions[stop_idx][None, :]
    m = jnp.max(alpha, axis=1)
    return m + jnp.log(jnp.sum(jnp.exp(alpha - m[:, None]), axis=1))


if __name__ == "__main__":
    # vocab_size = 6  =>  n_labels = 8
    vocab_size = 6
    n_labels = vocab_size + 2
    batch, seq_len = 2, 8

    key = jax.random.PRNGKey(0)
    k_trans, k_logits = jax.random.split(key)

    transitions = jax.random.normal(k_trans, (n_labels, n_labels), jnp.float32)
    logits = jax.random.normal(k_logits, (batch, seq_len, n_labels), jnp.float32)
    lens = jnp.array([seq_len, 5], dtype=jnp.int32)

    out = crf_forward(logits, lens, transitions)
    out = jax.block_until_ready(out)

    ref = crf_forward_ref(logits, lens, transitions)
    if not jnp.allclose(out, ref, atol=1e-4, rtol=1e-4):
        raise AssertionError(f"mismatch: pallas={out} ref={ref}")

    # TODO(synk): viterbi_decode / transition_score of the PyTorch module are not
    # implemented here (only the forward log-partition pass).
    print("KERNEL_OK")
</pallas_src>

<mosaic_0001>
module attributes {stable_mosaic.version = 11 : i64} {
  func.func @_crf_forward_kernel(%arg0: i32, %arg1: i32, %arg2: memref<1xi32, #tpu.memory_space<smem>>, %arg3: memref<1x128xi32, #tpu.memory_space<vmem>>, %arg4: memref<8x8x128xf32, #tpu.memory_space<vmem>>, %arg5: memref<8x8xf32, #tpu.memory_space<vmem>>, %arg6: memref<8x1xf32, #tpu.memory_space<vmem>>, %arg7: memref<8x1xf32, #tpu.memory_space<vmem>>, %arg8: memref<1x128xf32, #tpu.memory_space<vmem>>, %arg9: memref<8x128xf32, #tpu.memory_space<vmem>>) attributes {dimension_semantics = [#tpu.dimension_semantics<parallel>, #tpu.dimension_semantics<arbitrary>], iteration_bounds = array<i64: 1, 1>, scalar_prefetch = 1 : i64, scratch_operands = 1 : i64, tpu.core_type = #tpu.core_type<tc>, window_params = [{transform_indices = @transform_0, window_bounds = array<i64: 1, 128>}, {transform_indices = @transform_1, window_bounds = array<i64: 8, 8, 128>}, {pipeline_mode = #tpu.pipeline_mode<synchronous>, transform_indices = @transform_2, window_bounds = array<i64: 8, 8>}, {pipeline_mode = #tpu.pipeline_mode<synchronous>, transform_indices = @transform_3, window_bounds = array<i64: 8, 1>}, {pipeline_mode = #tpu.pipeline_mode<synchronous>, transform_indices = @transform_4, window_bounds = array<i64: 8, 1>}, {transform_indices = @transform_5, window_bounds = array<i64: 1, 128>}]} {
    %c0_i32 = arith.constant 0 : i32
    %0 = arith.cmpi eq, %arg1, %c0_i32 : i32
    %1 = arith.extui %0 : i1 to i32
    %c0_i32_0 = arith.constant 0 : i32
    %2 = arith.cmpi ne, %1, %c0_i32_0 : i32
    scf.if %2 {
      %12 = tpu.iota {dimensions = array<i32: 0>} : vector<8x128xi32>
      %c6_i32 = arith.constant 6 : i32
      %13 = vector.broadcast %c6_i32 : i32 to vector<8x128xi32>
      %14 = arith.cmpi eq, %12, %13 : vector<8x128xi32>
      %cst = arith.constant 0.000000e+00 : f32
      %cst_4 = arith.constant -1.000000e+04 : f32
      %15 = vector.broadcast %cst : f32 to vector<8x128xf32>
      %16 = vector.broadcast %cst_4 : f32 to vector<8x128xf32>
      %17 = arith.select %14, %15, %16 : vector<8x128xi1>, vector<8x128xf32>
      %c0 = arith.constant 0 : index
      %c0_5 = arith.constant 0 : index
      %18 = vector.load %arg9[%c0, %c0_5] : memref<8x128xf32, #tpu.memory_space<vmem>>, vector<8x128xf32>
      tpu.vector_store %arg9[%c0, %c0_5], %17 {strides = array<i32>} : memref<8x128xf32, #tpu.memory_space<vmem>>, vector<8x128xf32>,
    } else {
    }
    %c8_i32 = arith.constant 8 : i32
    %3 = arith.muli %arg1, %c8_i32 : i32
    %4 = arith.index_cast %arg0 : i32 to index
    %5 = memref.load %arg2[%4] : memref<1xi32, #tpu.memory_space<smem>>
    %6 = arith.cmpi slt, %3, %5 : i32
    %7 = arith.extui %6 : i1 to i32
    %c0_i32_1 = arith.constant 0 : i32
    %8 = arith.cmpi ne, %7, %c0_i32_1 : i32
    scf.if %8 {
      %c0 = arith.constant 0 : index
      %c0_4 = arith.constant 0 : index
      %12 = vector.load %arg3[%c0, %c0_4] : memref<1x128xi32, #tpu.memory_space<vmem>>, vector<1x128xi32>
      %c0_5 = arith.constant 0 : index
      %c0_6 = arith.constant 0 : index
      %13 = vector.load %arg5[%c0_5, %c0_6] : memref<8x8xf32, #tpu.memory_space<vmem>>, vector<8x8xf32>
      %c0_7 = arith.constant 0 : index
      %c0_8 = arith.constant 0 : index
      %14 = vector.load %arg6[%c0_7, %c0_8] : memref<8x1xf32, #tpu.memory_space<vmem>>, vector<8x1xf32>
      %15 = vector.shape_cast %14 : vector<8x1xf32> to vector<8x1xf32>
      %16 = vector.broadcast %15 : vector<8x1xf32> to vector<8x128xf32>
      %17 = vector.shape_cast %13 : vector<8x8xf32> to vector<8x8x1xf32>
      %18 = vector.shape_cast %17 : vector<8x8x1xf32> to vector<8x8x1xf32>
      %19 = vector.broadcast %18 : vector<8x8x1xf32> to vector<8x8x128xf32>
      %c0_9 = arith.constant 0 : index
      %c0_10 = arith.constant 0 : index
      %20 = vector.load %arg9[%c0_9, %c0_10] : memref<8x128xf32, #tpu.memory_space<vmem>>, vector<8x128xf32>
      %c0_i32_11 = arith.constant 0 : i32
      %21 = arith.index_cast %c0_i32_11 : i32 to index
      %c0_12 = arith.constant 0 : index
      %c0_13 = arith.constant 0 : index
      %22 = vector.load %arg4[%21, %c0_12, %c0_13] : memref<8x8x128xf32, #tpu.memory_space<vmem>>, vector<1x8x128xf32>
      %23 = vector.shape_cast %22 : vector<1x8x128xf32> to vector<8x128xf32>
      %cst = arith.constant dense<0xFF800000> : vector<128xf32>
      %24 = vector.multi_reduction <maximumf>, %20, %cst [0] : vector<8x128xf32> to vector<128xf32>
      %25 = vector.shape_cast %24 : vector<128xf32> to vector<1x128xf32>
      %26 = vector.broadcast %25 : vector<1x128xf32> to vector<8x128xf32>
      %27 = arith.subf %20, %26 : vector<8x128xf32>
      %28 = math.exp %27 : vector<8x128xf32>
      %29 = vector.shape_cast %28 : vector<8x128xf32> to vector<1x8x128xf32>
      %30 = vector.broadcast %29 : vector<1x8x128xf32> to vector<8x8x128xf32>
      %31 = arith.mulf %19, %30 : vector<8x8x128xf32>
      %cst_14 = arith.constant dense<0.000000e+00> : vector<8x128xf32>
      %32 = vector.multi_reduction <add>, %31, %cst_14 [1] : vector<8x8x128xf32> to vector<8x128xf32>
      %33 = math.log %32 : vector<8x128xf32>
      %34 = arith.addf %33, %16 : vector<8x128xf32>
      %35 = vector.broadcast %25 : vector<1x128xf32> to vector<8x128xf32>
      %36 = arith.addf %35, %23 : vector<8x128xf32>
      %37 = arith.addf %34, %36 : vector<8x128xf32>
      %38 = arith.addi %3, %c0_i32_11 : i32
      %39 = vector.broadcast %38 : i32 to vector<1x128xi32>
      %40 = arith.cmpi sgt, %12, %39 : vector<1x128xi32>
      %41 = vector.shape_cast %40 : vector<1x128xi1> to vector<1x128xi1>
      %42 = vector.broadcast %41 : vector<1x128xi1> to vector<8x128xi1>
      %43 = arith.select %42, %37, %20 : vector<8x128xi1>, vector<8x128xf32>
      %c1_i32 = arith.constant 1 : i32
      %44 = arith.index_cast %c1_i32 : i32 to index
      %c0_15 = arith.constant 0 : index
      %c0_16 = arith.constant 0 : index
      %45 = vector.load %arg4[%44, %c0_15, %c0_16] : memref<8x8x128xf32, #tpu.memory_space<vmem>>, vector<1x8x128xf32>
      %46 = vector.shape_cast %45 : vector<1x8x128xf32> to vector<8x128xf32>
      %cst_17 = arith.constant dense<0xFF800000> : vector<128xf32>
      %47 = vector.multi_reduction <maximumf>, %43, %cst_17 [0] : vector<8x128xf32> to vector<128xf32>
      %48 = vector.shape_cast %47 : vector<128xf32> to vector<1x128xf32>
      %49 = vector.broadcast %48 : vector<1x128xf32> to vector<8x128xf32>
      %50 = arith.subf %43, %49 : vector<8x128xf32>
      %51 = math.exp %50 : vector<8x128xf32>
      %52 = vector.shape_cast %51 : vector<8x128xf32> to vector<1x8x128xf32>
      %53 = vector.broadcast %52 : vector<1x8x128xf32> to vector<8x8x128xf32>
      %54 = arith.mulf %19, %53 : vector<8x8x128xf32>
      %cst_18 = arith.constant dense<0.000000e+00> : vector<8x128xf32>
      %55 = vector.multi_reduction <add>, %54, %cst_18 [1] : vector<8x8x128xf32> to vector<8x128xf32>
      %56 = math.log %55 : vector<8x128xf32>
      %57 = arith.addf %56, %16 : vector<8x128xf32>
      %58 = vector.broadcast %48 : vector<1x128xf32> to vector<8x128xf32>
      %59 = arith.addf %58, %46 : vector<8x128xf32>
      %60 = arith.addf %57, %59 : vector<8x128xf32>
      %61 = arith.addi %3, %c1_i32 : i32
      %62 = vector.broadcast %61 : i32 to vector<1x128xi32>
      %63 = arith.cmpi sgt, %12, %62 : vector<1x128xi32>
      %64 = vector.shape_cast %63 : vector<1x128xi1> to vector<1x128xi1>
      %65 = vector.broadcast %64 : vector<1x128xi1> to vector<8x128xi1>
      %66 = arith.select %65, %60, %43 : vector<8x128xi1>, vector<8x128xf32>
      %c2_i32 = arith.constant 2 : i32
      %67 = arith.index_cast %c2_i32 : i32 to index
      %c0_19 = arith.constant 0 : index
      %c0_20 = arith.constant 0 : index
      %68 = vector.load %arg4[%67, %c0_19, %c0_20] : memref<8x8x128xf32, #tpu.memory_space<vmem>>, vector<1x8x128xf32>
      %69 = vector.shape_cast %68 : vector<1x8x128xf32> to vector<8x128xf32>
      %cst_21 = arith.constant dense<0xFF800000> : vector<128xf32>
      %70 = vector.multi_reduction <maximumf>, %66, %cst_21 [0] : vector<8x128xf32> to vector<128xf32>
      %71 = vector.shape_cast %70 : vector<128xf32> to vector<1x128xf32>
      %72 = vector.broadcast %71 : vector<1x128xf32> to vector<8x128xf32>
      %73 = arith.subf %66, %72 : vector<8x128xf32>
      %74 = math.exp %73 : vector<8x128xf32>
      %75 = vector.shape_cast %74 : vector<8x128xf32> to vector<1x8x128xf32>
      %76 = vector.broadcast %75 : vector<1x8x128xf32> to vector<8x8x128xf32>
      %77 = arith.mulf %19, %76 : vector<8x8x128xf32>
      %cst_22 = arith.constant dense<0.000000e+00> : vector<8x128xf32>
      %78 = vector.multi_reduction <add>, %77, %cst_22 [1] : vector<8x8x128xf32> to vector<8x128xf32>
      %79 = math.log %78 : vector<8x128xf32>
      %80 = arith.addf %79, %16 : vector<8x128xf32>
      %81 = vector.broadcast %71 : vector<1x128xf32> to vector<8x128xf32>
      %82 = arith.addf %81, %69 : vector<8x128xf32>
      %83 = arith.addf %80, %82 : vector<8x128xf32>
      %84 = arith.addi %3, %c2_i32 : i32
      %85 = vector.broadcast %84 : i32 to vector<1x128xi32>
      %86 = arith.cmpi sgt, %12, %85 : vector<1x128xi32>
      %87 = vector.shape_cast %86 : vector<1x128xi1> to vector<1x128xi1>
      %88 = vector.broadcast %87 : vector<1x128xi1> to vector<8x128xi1>
      %89 = arith.select %88, %83, %66 : vector<8x128xi1>, vector<8x128xf32>
      %c3_i32 = arith.constant 3 : i32
      %90 = arith.index_cast %c3_i32 : i32 to index
      %c0_23 = arith.constant 0 : index
      %c0_24 = arith.constant 0 : index
      %91 = vector.load %arg4[%90, %c0_23, %c0_24] : memref<8x8x128xf32, #tpu.memory_space<vmem>>, vector<1x8x128xf32>
      %92 = vector.shape_cast %91 : vector<1x8x128xf32> to vector<8x128xf32>
      %cst_25 = arith.constant dense<0xFF800000> : vector<128xf32>
      %93 = vector.multi_reduction <maximumf>, %89, %cst_25 [0] : vector<8x128xf32> to vector<128xf32>
      %94 = vector.shape_cast %93 : vector<128xf32> to vector<1x128xf32>
      %95 = vector.broadcast %94 : vector<1x128xf32> to vector<8x128xf32>
      %96 = arith.subf %89, %95 : vector<8x128xf32>
      %97 = math.exp %96 : vector<8x128xf32>
      %98 = vector.shape_cast %97 : vector<8x128xf32> to vector<1x8x128xf32>
      %99 = vector.broadcast %98 : vector<1x8x128xf32> to vector<8x8x128xf32>
      %100 = arith.mulf %19, %99 : vector<8x8x128xf32>
      %cst_26 = arith.constant dense<0.000000e+00> : vector<8x128xf32>
      %101 = vector.multi_reduction <add>, %100, %cst_26 [1] : vector<8x8x128xf32> to vector<8x128xf32>
      %102 = math.log %101 : vector<8x128xf32>
      %103 = arith.addf %102, %16 : vector<8x128xf32>
      %104 = vector.broadcast %94 : vector<1x128xf32> to vector<8x128xf32>
      %105 = arith.addf %104, %92 : vector<8x128xf32>
      %106 = arith.addf %103, %105 : vector<8x128xf32>
      %107 = arith.addi %3, %c3_i32 : i32
      %108 = vector.broadcast %107 : i32 to vector<1x128xi32>
      %109 = arith.cmpi sgt, %12, %108 : vector<1x128xi32>
      %110 = vector.shape_cast %109 : vector<1x128xi1> to vector<1x128xi1>
      %111 = vector.broadcast %110 : vector<1x128xi1> to vector<8x128xi1>
      %112 = arith.select %111, %106, %89 : vector<8x128xi1>, vector<8x128xf32>
      %c4_i32 = arith.constant 4 : i32
      %113 = arith.index_cast %c4_i32 : i32 to index
      %c0_27 = arith.constant 0 : index
      %c0_28 = arith.constant 0 : index
      %114 = vector.load %arg4[%113, %c0_27, %c0_28] : memref<8x8x128xf32, #tpu.memory_space<vmem>>, vector<1x8x128xf32>
      %115 = vector.shape_cast %114 : vector<1x8x128xf32> to vector<8x128xf32>
      %cst_29 = arith.constant dense<0xFF800000> : vector<128xf32>
      %116 = vector.multi_reduction <maximumf>, %112, %cst_29 [0] : vector<8x128xf32> to vector<128xf32>
      %117 = vector.shape_cast %116 : vector<128xf32> to vector<1x128xf32>
      %118 = vector.broadcast %117 : vector<1x128xf32> to vector<8x128xf32>
      %119 = arith.subf %112, %118 : vector<8x128xf32>
      %120 = math.exp %119 : vector<8x128xf32>
      %121 = vector.shape_cast %120 : vector<8x128xf32> to vector<1x8x128xf32>
      %122 = vector.broadcast %121 : vector<1x8x128xf32> to vector<8x8x128xf32>
      %123 = arith.mulf %19, %122 : vector<8x8x128xf32>
      %cst_30 = arith.constant dense<0.000000e+00> : vector<8x128xf32>
      %124 = vector.multi_reduction <add>, %123, %cst_30 [1] : vector<8x8x128xf32> to vector<8x128xf32>
      %125 = math.log %124 : vector<8x128xf32>
      %126 = arith.addf %125, %16 : vector<8x128xf32>
      %127 = vector.broadcast %117 : vector<1x128xf32> to vector<8x128xf32>
      %128 = arith.addf %127, %115 : vector<8x128xf32>
      %129 = arith.addf %126, %128 : vector<8x128xf32>
      %130 = arith.addi %3, %c4_i32 : i32
      %131 = vector.broadcast %130 : i32 to vector<1x128xi32>
      %132 = arith.cmpi sgt, %12, %131 : vector<1x128xi32>
      %133 = vector.shape_cast %132 : vector<1x128xi1> to vector<1x128xi1>
      %134 = vector.broadcast %133 : vector<1x128xi1> to vector<8x128xi1>
      %135 = arith.select %134, %129, %112 : vector<8x128xi1>, vector<8x128xf32>
      %c5_i32 = arith.constant 5 : i32
      %136 = arith.index_cast %c5_i32 : i32 to index
      %c0_31 = arith.constant 0 : index
      %c0_32 = arith.constant 0 : index
      %137 = vector.load %arg4[%136, %c0_31, %c0_32] : memref<8x8x128xf32, #tpu.memory_space<vmem>>, vector<1x8x128xf32>
      %138 = vector.shape_cast %137 : vector<1x8x128xf32> to vector<8x128xf32>
      %cst_33 = arith.constant dense<0xFF800000> : vector<128xf32>
      %139 = vector.multi_reduction <maximumf>, %135, %cst_33 [0] : vector<8x128xf32> to vector<128xf32>
      %140 = vector.shape_cast %139 : vector<128xf32> to vector<1x128xf32>
      %141 = vector.broadcast %140 : vector<1x128xf32> to vector<8x128xf32>
      %142 = arith.subf %135, %141 : vector<8x128xf32>
      %143 = math.exp %142 : vector<8x128xf32>
      %144 = vector.shape_cast %143 : vector<8x128xf32> to vector<1x8x128xf32>
      %145 = vector.broadcast %144 : vector<1x8x128xf32> to vector<8x8x128xf32>
      %146 = arith.mulf %19, %145 : vector<8x8x128xf32>
      %cst_34 = arith.constant dense<0.000000e+00> : vector<8x128xf32>
      %147 = vector.multi_reduction <add>, %146, %cst_34 [1] : vector<8x8x128xf32> to vector<8x128xf32>
      %148 = math.log %147 : vector<8x128xf32>
      %149 = arith.addf %148, %16 : vector<8x128xf32>
      %150 = vector.broadcast %140 : vector<1x128xf32> to vector<8x128xf32>
      %151 = arith.addf %150, %138 : vector<8x128xf32>
      %152 = arith.addf %149, %151 : vector<8x128xf32>
      %153 = arith.addi %3, %c5_i32 : i32
      %154 = vector.broadcast %153 : i32 to vector<1x128xi32>
      %155 = arith.cmpi sgt, %12, %154 : vector<1x128xi32>
      %156 = vector.shape_cast %155 : vector<1x128xi1> to vector<1x128xi1>
      %157 = vector.broadcast %156 : vector<1x128xi1> to vector<8x128xi1>
      %158 = arith.select %157, %152, %135 : vector<8x128xi1>, vector<8x128xf32>
      %c6_i32 = arith.constant 6 : i32
      %159 = arith.index_cast %c6_i32 : i32 to index
      %c0_35 = arith.constant 0 : index
      %c0_36 = arith.constant 0 : index
      %160 = vector.load %arg4[%159, %c0_35, %c0_36] : memref<8x8x128xf32, #tpu.memory_space<vmem>>, vector<1x8x128xf32>
      %161 = vector.shape_cast %160 : vector<1x8x128xf32> to vector<8x128xf32>
      %cst_37 = arith.constant dense<0xFF800000> : vector<128xf32>
      %162 = vector.multi_reduction <maximumf>, %158, %cst_37 [0] : vector<8x128xf32> to vector<128xf32>
      %163 = vector.shape_cast %162 : vector<128xf32> to vector<1x128xf32>
      %164 = vector.broadcast %163 : vector<1x128xf32> to vector<8x128xf32>
      %165 = arith.subf %158, %164 : vector<8x128xf32>
      %166 = math.exp %165 : vector<8x128xf32>
      %167 = vector.shape_cast %166 : vector<8x128xf32> to vector<1x8x128xf32>
      %168 = vector.broadcast %167 : vector<1x8x128xf32> to vector<8x8x128xf32>
      %169 = arith.mulf %19, %168 : vector<8x8x128xf32>
      %cst_38 = arith.constant dense<0.000000e+00> : vector<8x128xf32>
      %170 = vector.multi_reduction <add>, %169, %cst_38 [1] : vector<8x8x128xf32> to vector<8x128xf32>
      %171 = math.log %170 : vector<8x128xf32>
      %172 = arith.addf %171, %16 : vector<8x128xf32>
      %173 = vector.broadcast %163 : vector<1x128xf32> to vector<8x128xf32>
      %174 = arith.addf %173, %161 : vector<8x128xf32>
      %175 = arith.addf %172, %174 : vector<8x128xf32>
      %176 = arith.addi %3, %c6_i32 : i32
      %177 = vector.broadcast %176 : i32 to vector<1x128xi32>
      %178 = arith.cmpi sgt, %12, %177 : vector<1x128xi32>
      %179 = vector.shape_cast %178 : vector<1x128xi1> to vector<1x128xi1>
      %180 = vector.broadcast %179 : vector<1x128xi1> to vector<8x128xi1>
      %181 = arith.select %180, %175, %158 : vector<8x128xi1>, vector<8x128xf32>
      %c7_i32 = arith.constant 7 : i32
      %182 = arith.index_cast %c7_i32 : i32 to index
      %c0_39 = arith.constant 0 : index
      %c0_40 = arith.constant 0 : index
      %183 = vector.load %arg4[%182, %c0_39, %c0_40] : memref<8x8x128xf32, #tpu.memory_space<vmem>>, vector<1x8x128xf32>
      %184 = vector.shape_cast %183 : vector<1x8x128xf32> to vector<8x128xf32>
      %cst_41 = arith.constant dense<0xFF800000> : vector<128xf32>
      %185 = vector.multi_reduction <maximumf>, %181, %cst_41 [0] : vector<8x128xf32> to vector<128xf32>
      %186 = vector.shape_cast %185 : vector<128xf32> to vector<1x128xf32>
      %187 = vector.broadcast %186 : vector<1x128xf32> to vector<8x128xf32>
      %188 = arith.subf %181, %187 : vector<8x128xf32>
      %189 = math.exp %188 : vector<8x128xf32>
      %190 = vector.shape_cast %189 : vector<8x128xf32> to vector<1x8x128xf32>
      %191 = vector.broadcast %190 : vector<1x8x128xf32> to vector<8x8x128xf32>
      %192 = arith.mulf %19, %191 : vector<8x8x128xf32>
      %cst_42 = arith.constant dense<0.000000e+00> : vector<8x128xf32>
      %193 = vector.multi_reduction <add>, %192, %cst_42 [1] : vector<8x8x128xf32> to vector<8x128xf32>
      %194 = math.log %193 : vector<8x128xf32>
      %195 = arith.addf %194, %16 : vector<8x128xf32>
      %196 = vector.broadcast %186 : vector<1x128xf32> to vector<8x128xf32>
      %197 = arith.addf %196, %184 : vector<8x128xf32>
      %198 = arith.addf %195, %197 : vector<8x128xf32>
      %199 = arith.addi %3, %c7_i32 : i32
      %200 = vector.broadcast %199 : i32 to vector<1x128xi32>
      %201 = arith.cmpi sgt, %12, %200 : vector<1x128xi32>
      %202 = vector.shape_cast %201 : vector<1x128xi1> to vector<1x128xi1>
      %203 = vector.broadcast %202 : vector<1x128xi1> to vector<8x128xi1>
      %204 = arith.select %203, %198, %181 : vector<8x128xi1>, vector<8x128xf32>
      %c8_i32_43 = arith.constant 8 : i32
      %c0_44 = arith.constant 0 : index
      %c0_45 = arith.constant 0 : index
      %205 = vector.load %arg9[%c0_44, %c0_45] : memref<8x128xf32, #tpu.memory_space<vmem>>, vector<8x128xf32>
      tpu.vector_store %arg9[%c0_44, %c0_45], %204 {strides = array<i32>} : memref<8x128xf32, #tpu.memory_space<vmem>>, vector<8x128xf32>,
    } else {
    }
    %c0_i32_2 = arith.constant 0 : i32
    %9 = arith.cmpi eq, %arg1, %c0_i32_2 : i32
    %10 = arith.extui %9 : i1 to i32
    %c0_i32_3 = arith.constant 0 : i32
    %11 = arith.cmpi ne, %10, %c0_i32_3 : i32
    scf.if %11 {
      %c0 = arith.constant 0 : index
      %c0_4 = arith.constant 0 : index
      %12 = vector.load %arg9[%c0, %c0_4] : memref<8x128xf32, #tpu.memory_space<vmem>>, vector<8x128xf32>
      %c0_5 = arith.constant 0 : index
      %c0_6 = arith.constant 0 : index
      %13 = vector.load %arg7[%c0_5, %c0_6] : memref<8x1xf32, #tpu.memory_space<vmem>>, vector<8x1xf32>
      %14 = vector.broadcast %13 : vector<8x1xf32> to vector<8x128xf32>
      %15 = arith.addf %12, %14 : vector<8x128xf32>
      %cst = arith.constant dense<0xFF800000> : vector<128xf32>
      %16 = vector.multi_reduction <maximumf>, %15, %cst [0] : vector<8x128xf32> to vector<128xf32>
      %17 = vector.shape_cast %16 : vector<128xf32> to vector<1x128xf32>
      %18 = vector.broadcast %17 : vector<1x128xf32> to vector<8x128xf32>
      %19 = arith.subf %15, %18 : vector<8x128xf32>
      %20 = math.exp %19 : vector<8x128xf32>
      %cst_7 = arith.constant dense<0.000000e+00> : vector<128xf32>
      %21 = vector.multi_reduction <add>, %20, %cst_7 [0] : vector<8x128xf32> to vector<128xf32>
      %22 = vector.shape_cast %21 : vector<128xf32> to vector<1x128xf32>
      %23 = math.log %22 : vector<1x128xf32>
      %24 = arith.addf %17, %23 : vector<1x128xf32>
      %c0_8 = arith.constant 0 : index
      %c0_9 = arith.constant 0 : index
      %25 = vector.load %arg8[%c0_8, %c0_9] : memref<1x128xf32, #tpu.memory_space<vmem>>, vector<1x128xf32>
      tpu.vector_store %arg8[%c0_8, %c0_9], %24 {strides = array<i32>} : memref<1x128xf32, #tpu.memory_space<vmem>>, vector<1x128xf32>,
    } else {
    }
    return
  }
  func.func @transform_0(%arg0: i32, %arg1: i32, %arg2: memref<1xi32, #tpu.memory_space<smem>>) -> (i32, i32) {
    %c0_i32 = arith.constant 0 : i32
    %c0_i32_0 = arith.constant 0 : i32
    return %c0_i32, %arg0 : i32, i32
  }
  func.func @transform_1(%arg0: i32, %arg1: i32, %arg2: memref<1xi32, #tpu.memory_space<smem>>) -> (i32, i32, i32) {
    %c0_i32 = arith.constant 0 : i32
    %c0_i32_0 = arith.constant 0 : i32
    return %arg1, %c0_i32, %arg0 : i32, i32, i32
  }
  func.func @transform_2(%arg0: i32, %arg1: i32, %arg2: memref<1xi32, #tpu.memory_space<smem>>) -> (i32, i32) {
    %c0_i32 = arith.constant 0 : i32
    %c0_i32_0 = arith.constant 0 : i32
    %c0_i32_1 = arith.constant 0 : i32
    return %c0_i32, %c0_i32_0 : i32, i32
  }
  func.func @transform_3(%arg0: i32, %arg1: i32, %arg2: memref<1xi32, #tpu.memory_space<smem>>) -> (i32, i32) {
    %c0_i32 = arith.constant 0 : i32
    %c0_i32_0 = arith.constant 0 : i32
    %c0_i32_1 = arith.constant 0 : i32
    return %c0_i32, %c0_i32_0 : i32, i32
  }
  func.func @transform_4(%arg0: i32, %arg1: i32, %arg2: memref<1xi32, #tpu.memory_space<smem>>) -> (i32, i32) {
    %c0_i32 = arith.constant 0 : i32
    %c0_i32_0 = arith.constant 0 : i32
    %c0_i32_1 = arith.constant 0 : i32
    return %c0_i32, %c0_i32_0 : i32, i32
  }
  func.func @transform_5(%arg0: i32, %arg1: i32, %arg2: memref<1xi32, #tpu.memory_space<smem>>) -> (i32, i32) {
    %c0_i32 = arith.constant 0 : i32
    %c0_i32_0 = arith.constant 0 : i32
    return %c0_i32, %arg0 : i32, i32
  }
}

</mosaic_0001>

<bundles_post_ra>
// kernel: tpu_custom_call.1
= control target key start
LH: loop header
LB: loop body
LE: loop exit
PB: predicated region body
PF: predicated region fallthrough
CT: control target
= control target key end

     0   :  { %12 = vsyncpa [#allocation6], 0  ;;  %s2034_s0 = inlined_call_operand.<no memory space> [shape: s32[1], index: 0, kind: input, shape index: {}]   ;;  %s2035_s1 = inlined_call_operand.vmem [shape: s32[1,128], index: 1, kind: input, shape index: {}]   ;;  %s2036_s2 = inlined_call_operand.hbm [shape: f32[8,8,128], index: 2, kind: input, shape index: {}]   ;;  %s2037_s3 = inlined_call_operand.vmem [shape: f32[8,8], index: 3, kind: input, shape index: {}]   ;;  %s2038_s4 = inlined_call_operand.vmem [shape: f32[8,1], index: 4, kind: input, shape index: {}]   ;;  %s2039_s5 = inlined_call_operand.vmem [shape: f32[8,1], index: 5, kind: input, shape index: {}]   ;;  %s2040_s6 = inlined_call_operand.hbm [shape: f32[1,128], index: 6, kind: output, shape index: {}]  }
   0x1   :  { %13 = vsyncpa [#allocation7], 0  ;;  %s1581_s21 = smov [#allocation5]   ;;  %s1533_s25 = scalar_lea.hbm %s2036_s2, 1024 }
   0x2   :  { %s21_s22 = sshll.u32 %s1581_s21, 4  ;;  %p1534_p0 = scmp.ne.s32.totalorder %s2036_s2, %s1533_s25  ;;  %s22_s22 = int_to_ptr.vmem [resolvable:$true] %s21_s22 }
   0x3   :  { %p1537_p1 = scmp.lt.u32.totalorder %s1533_s25, %s2036_s2 }
   0x5   :  { %p1539_p2 = pnand %p1537_p1, %p1534_p0 }
   0x7   :  { %1542 = shalt.err (!%p1539_p2)
}
   0x8   :  { %s1543_s30 = scalar_lea.vmem %s22_s22, 1024  ;;  %p1548_p4 = scmp.lt.s32.totalorder %s22_s22, %s22_s22 }
   0x9   :  { %p1544_p3 = scmp.ne.s32.totalorder %s22_s22, %s1543_s30  ;;  %p1549_p5 = scmp.lt.s32.totalorder %s1543_s30, %s1543_s30 }
   0xb   :  { %p1550_p6 = por %p1549_p5, %p1548_p4 }
   0xd   :  { %p1551_p7 = pnand %p1550_p6, %p1544_p3 }
   0xf   :  { %1554 = shalt.err (!%p1551_p7)
}
  0x10   :  { %s1582_s7 = smov 128   ;;  %s1583_s8 = smov 8  }
  0x11   :  { %27 = dma.hbm_to_vmem [thread:$0]  %s2036_s2, 1024, %s22_s22, [#allocation6], %s1582_s7, %s1582_s7, %s1583_s8  }
  0x12   :  { %1577 = dma.done.wait [#allocation6], 1024  }
  0x13   :  { %1578 = vsyncadd [#allocation6], 4294966272  ;;  %v41_v0 = vlaneseq  ;;  %v1584_v2 = vmov -10000.0   ;;  %p1375_p8 = scmp.le.s32.totalorder %s2034_s0, 0 }
  0x14   :  { %v53_v4 = vld [vmem:[%s2037_s3] sm:$0xff] (!%p1375_p8)  ;;  %v1585_v17 = vmov (!%p1375_p8), 0   ;;  %vm263_vm9 = vcmask (!%p1375_p8), 1041409   ;;  %vm266_vm10 = vcmask (!%p1375_p8), 1042434   ;;  %vm269_vm11 = vcmask (!%p1375_p8), 1043459  }
  0x15   :  { %v42_v1 = vshrl.u32 %v41_v0, 7  ;;  %51 = sbr.rel (%p1375_p8) target bundleno = 675 (0x2a3), region = 33  ;;  %v52_v9 = vld [vmem:[%s2035_s1] sm:$0x1] (!%p1375_p8)  ;;  %1383 = vset.pattern.permute.xlu0 (!%p1375_p8), %v1585_v17  ;;  %vm272_vm12 = vcmask (!%p1375_p8), 1044484   ;;  %vm275_vm13 = vcmask (!%p1375_p8), 1045509  }
  0x16   :  { %vm247_vm1 = vcmp.gt.s32.totalorder (!%p1375_p8), %v52_v9, 0  ;;  %vm403_vm2 = vcmp.gt.s32.totalorder (!%p1375_p8), %v52_v9, 1  ;;  %vm552_vm3 = vcmp.gt.s32.totalorder (!%p1375_p8), %v52_v9, 2  ;;  %vm701_vm4 = vcmp.gt.s32.totalorder (!%p1375_p8), %v52_v9, 3  ;;  %v54_v39 = vld [vmem:[%s2038_s4] sm:$0xff] (!%p1375_p8) }
  0x17   :  { %vm43_vm0 = vcmp.eq.s32.totalorder %v42_v1, 6  ;;  %v68_v5 = vsub.s32 (!%p1375_p8), 1, %v42_v1  ;;  %v1641_v6 = vsub.s32 (!%p1375_p8), 0, %v42_v1  ;;  %v75_v7 = vsub.s32 (!%p1375_p8), 2, %v42_v1 }
  0x18   :  { %v44_v3 = vsel %vm43_vm0, 0.0, %v1584_v2  ;;  %v82_v8 = vsub.s32 (!%p1375_p8), 3, %v42_v1  ;;  %v89_v12 = vsub.s32 (!%p1375_p8), 4, %v42_v1  ;;  %v96_v15 = vsub.s32 (!%p1375_p8), 5, %v42_v1 }
  0x19   :  { %45 = vst [vmem:[#allocation2] sm:$0xff] %v44_v3  ;;  %v69_v10 = vrot.slane (!%p1375_p8), %v53_v4, %v68_v5  ;;  %v62_v11 = vrot.slane (!%p1375_p8), %v53_v4, %v1641_v6  ;;  %v76_v13 = vrot.slane (!%p1375_p8), %v53_v4, %v75_v7  ;;  %v103_v16 = vsub.s32 (!%p1375_p8), 6, %v42_v1 }
  0x1a   :  { %v83_v14 = vrot.slane (!%p1375_p8), %v53_v4, %v82_v8  ;;  %v1647_v18 = vsel (!%p1375_p8), %vm247_vm1, 1, %v1585_v17  ;;  %v1649_v19 = vsel (!%p1375_p8), %vm403_vm2, 1, %v1585_v17  ;;  %v1651_v20 = vsel (!%p1375_p8), %vm552_vm3, 1, %v1585_v17 }
  0x1b   :  { %71 = vbcast.lane.b32.xlu0 (!%p1375_p8), %v69_v10, 256  ;;  %64 = vbcast.lane.b32.xlu1 (!%p1375_p8), %v62_v11, 256  ;;  %v252_v21 = vrot.slane (!%p1375_p8), %v1647_v18, %v1641_v6  ;;  %v408_v22 = vrot.slane (!%p1375_p8), %v1649_v19, %v1641_v6  ;;  %v557_v23 = vrot.slane (!%p1375_p8), %v1651_v20, %v1641_v6  ;;  %v1659_v24 = vsel (!%p1375_p8), %vm701_vm4, 1, %v1585_v17 }
  0x1c   :  { %vm850_vm5 = vcmp.gt.s32.totalorder %v52_v9, 4  ;;  %vm999_vm6 = vcmp.gt.s32.totalorder %v52_v9, 5  ;;  %vm1148_vm7 = vcmp.gt.s32.totalorder %v52_v9, 6  ;;  %v90_v26 = vrot.slane %v53_v4, %v89_v12 }
  0x1d   :  { %v97_v27 = vrot.slane %v53_v4, %v96_v15  ;;  %v110_v28 = vsub.s32 7, %v42_v1  ;;  %v1663_v29 = vsel %vm850_vm5, 1, %v1585_v17  ;;  %v1667_v31 = vsel %vm999_vm6, 1, %v1585_v17 }
  0x1e   :  { %v1669_v32 = vsel %vm1148_vm7, 1, %v1585_v17  ;;  %vm1297_vm8 = vcmp.gt.s32.totalorder %v52_v9, 7  ;;  %v104_v36 = vrot.slane %v53_v4, %v103_v16  ;;  %vm278_vm14 = vcmask 1046534  }
  0x1f   :  { %78 = vbcast.lane.b32.xlu0 %v76_v13, 256  ;;  %85 = vbcast.lane.b32.xlu1 %v83_v14, 256  ;;  %v1675_v35 = vsel %vm1297_vm8, 1, %v1585_v17  ;;  %v111_v37 = vrot.slane %v53_v4, %v110_v28  ;;  %vm281_vm15 = vcmask 1047559   ;;  %vm253_vm0 = vcmp.eq.s32.totalorder %v252_v21, 1 }
  0x20   :  { %v1682_v40 = vld [vmem:[#allocation2] sm:$0xff]  ;;  %vm409_vm1 = vcmp.eq.s32.totalorder %v408_v22, 1  ;;  %vm558_vm2 = vcmp.eq.s32.totalorder %v557_v23, 1 }
  0x21   :  { %v117_v41 = vrot.slane %v1682_v40, 4 }
  0x23   :  { %92 = vbcast.lane.b32.xlu0 %v90_v26, 256  ;;  %99 = vbcast.lane.b32.xlu1 %v97_v27, 256  ;;  %v118_v42 = vmax.f32 %v1682_v40, %v117_v41 }
  0x25   :  { %v119_v43 = vrot.slane %v118_v42, 2 }
  0x27   :  { %106 = vbcast.lane.b32.xlu0 %v104_v36, 256  ;;  %113 = vbcast.lane.b32.xlu1 %v111_v37, 256  ;;  %v120_v44 = vmax.f32 %v118_v42, %v119_v43 }
  0x29   :  { %v121_v45 = vrot.slane %v120_v44, 1 }
  0x2b   :  { %57 = vperm.xlu0 %1383, %v54_v39   ;;  %v1686_v46 = vmax.f32 %v120_v44, %v121_v45 }
  0x2d   :  { %v123_v47 = vsub.f32 %v1682_v40, %v1686_v46 }
  0x2f   :  { %v124_v48 = vmul.f32 1.442695, %v123_v47 }
  0x31   :  { %1384 = vpow2.f32 %v124_v48 }
  0x3b   :  { %v1385_v49 = vpop.eup %1384 }
  0x8d   :  { %v1690_v50 = vpop.permute.xlu0 %71  ;;  %v1692_v51 = vpop.permute.xlu1 %64 }
  0x8e   :  { %v127_v52 = vmul.f32 %v1385_v49, %v1690_v50  ;;  %v126_v53 = vmul.f32 %v1385_v49, %v1692_v51 }
  0x90   :  { %v140_v54 = vrot.slane %v127_v52, 4  ;;  %v134_v55 = vrot.slane %v126_v53, 4 }
  0x91   :  { %v1696_v56 = vpop.permute.xlu0 %78  ;;  %v1698_v57 = vpop.permute.xlu1 %85 }
  0x92   :  { %v141_v58 = vadd.f32 %v140_v54, %v127_v52  ;;  %v135_v59 = vadd.f32 %v134_v55, %v126_v53  ;;  %v128_v60 = vmul.f32 %v1385_v49, %v1696_v56  ;;  %v129_v61 = vmul.f32 %v1385_v49, %v1698_v57 }
  0x94   :  { %v142_v62 = vrot.slane %v141_v58, 2  ;;  %v136_v63 = vrot.slane %v135_v59, 2  ;;  %v146_v0 = vrot.slane %v128_v60, 4  ;;  %v152_v1 = vrot.slane %v129_v61, 4 }
  0x95   :  { %v1702_v2 = vpop.permute.xlu0 %92  ;;  %v1704_v3 = vpop.permute.xlu1 %99 }
  0x96   :  { %v143_v4 = vadd.f32 %v142_v62, %v141_v58  ;;  %v137_v5 = vadd.f32 %v136_v63, %v135_v59  ;;  %v147_v7 = vadd.f32 %v146_v0, %v128_v60  ;;  %v153_v8 = vadd.f32 %v152_v1, %v129_v61  ;;  %v116_v1 = vld [vmem:[#allocation5] sm:$0xff] }
  0x97   :  { %v130_v9 = vmul.f32 %v1385_v49, %v1702_v2  ;;  %v131_v10 = vmul.f32 %v1385_v49, %v1704_v3 }
  0x98   :  { %v144_v11 = vrot.slane %v143_v4, 1  ;;  %v138_v12 = vrot.slane %v137_v5, 1  ;;  %v148_v13 = vrot.slane %v147_v7, 2  ;;  %v154_v14 = vrot.slane %v153_v8, 2 }
  0x99   :  { %v158_v15 = vrot.slane %v130_v9, 4  ;;  %v164_v16 = vrot.slane %v131_v10, 4  ;;  %v1708_v17 = vpop.permute.xlu0 %106  ;;  %v1710_v26 = vpop.permute.xlu1 %113 }
  0x9a   :  { %v145_v27 = vadd.f32 %v144_v11, %v143_v4  ;;  %v139_v28 = vadd.f32 %v138_v12, %v137_v5  ;;  %v149_v36 = vadd.f32 %v148_v13, %v147_v7  ;;  %v155_v37 = vadd.f32 %v154_v14, %v153_v8 }
  0x9b   :  { %v159_v39 = vadd.f32 %v158_v15, %v130_v9  ;;  %v165_v41 = vadd.f32 %v164_v16, %v131_v10  ;;  %v132_v42 = vmul.f32 %v1385_v49, %v1708_v17  ;;  %v133_v43 = vmul.f32 %v1385_v49, %v1710_v26 }
  0x9c   :  { %1386 = vlog2.f32 %v145_v27  ;;  %v150_v44 = vrot.slane %v149_v36, 1  ;;  %v156_v45 = vrot.slane %v155_v37, 1  ;;  %v1715_v10 = vadd.f32 %v1686_v46, %v116_v1 }
  0x9d   :  { %1388 = vlog2.f32 %v139_v28  ;;  %v160_v47 = vrot.slane %v159_v39, 2  ;;  %v166_v48 = vrot.slane %v165_v41, 2  ;;  %v170_v52 = vrot.slane %v132_v42, 4 }
  0x9e   :  { %v151_v53 = vadd.f32 %v150_v44, %v149_v36  ;;  %v157_v54 = vadd.f32 %v156_v45, %v155_v37  ;;  %v176_v55 = vrot.slane %v133_v43, 4  ;;  %v223_v16 = vrot.slane %v1715_v10, 1 }
  0x9f   :  { %v161_v58 = vadd.f32 %v160_v47, %v159_v39  ;;  %v167_v59 = vadd.f32 %v166_v48, %v165_v41  ;;  %v171_v60 = vadd.f32 %v170_v52, %v132_v42  ;;  %v224_v37 = vrot.slane %v1715_v10, 2 }
  0xa0   :  { %1390 = vlog2.f32 %v151_v53  ;;  %v177_v61 = vadd.f32 %v176_v55, %v133_v43  ;;  %v225_v47 = vrot.slane %v1715_v10, 3 }
  0xa1   :  { %1392 = vlog2.f32 %v157_v54  ;;  %v162_v62 = vrot.slane %v161_v58, 1  ;;  %v168_v63 = vrot.slane %v167_v59, 1  ;;  %v172_v0 = vrot.slane %v171_v60, 2 }
  0xa2   :  { %v178_v49 = vrot.slane %v177_v61, 2  ;;  %v226_v54 = vrot.slane %v1715_v10, 4 }
  0xa3   :  { %v163_v4 = vadd.f32 %v162_v62, %v161_v58  ;;  %v169_v5 = vadd.f32 %v168_v63, %v167_v59  ;;  %v173_v7 = vadd.f32 %v172_v0, %v171_v60  ;;  %v227_v60 = vrot.slane %v1715_v10, 5 }
  0xa4   :  { %v179_v8 = vadd.f32 %v178_v49, %v177_v61 }
  0xa5   :  { %1394 = vlog2.f32 %v163_v4  ;;  %v174_v9 = vrot.slane %v173_v7, 1 }
  0xa6   :  { %v1387_v11 = vpop.eup %1386  ;;  %1396 = vlog2.f32 %v169_v5  ;;  %v180_v12 = vrot.slane %v179_v8, 1 }
  0xa7   :  { %v1389_v13 = vpop.eup %1388  ;;  %v175_v14 = vadd.f32 %v174_v9, %v173_v7  ;;  %v185_v28 = vmul.f32 0.6931472, %v1387_v11  ;;  %v228_v9 = vrot.slane %v1715_v10, 6  ;;  %v229_v11 = vrot.slane %v1715_v10, 7 }
  0xa8   :  { %v181_v15 = vadd.f32 %v180_v12, %v179_v8  ;;  %v183_v36 = vmul.f32 0.6931472, %v1389_v13 }
  0xa9   :  { %1398 = vlog2.f32 %v175_v14 }
  0xaa   :  { %v1391_v27 = vpop.eup %1390  ;;  %1400 = vlog2.f32 %v181_v15  ;;  %v1719_v39 = vpop.permute.xlu0 %57 }
  0xab   :  { %v1393_v41 = vpop.eup %1392  ;;  %v187_v46 = vmul.f32 0.6931472, %v1391_v27  ;;  %v1722_v42 = vrot.slane %v1719_v39, 1  ;;  %v1725_v43 = vrot.slane %v1719_v39, 2  ;;  %v1728_v44 = vrot.slane %v1719_v39, 3 }
  0xac   :  { %v189_v45 = vmul.f32 0.6931472, %v1393_v41  ;;  %v213_v48 = vadd.f32 %v183_v36, %v1719_v39  ;;  %v1736_v55 = vrot.slane %v1719_v39, 4  ;;  %v1741_v61 = vrot.slane %v1719_v39, 5 }
  0xad   :  { %v214_v52 = vadd.f32 %v1722_v42, %v185_v28  ;;  %v215_v53 = vadd.f32 %v1725_v43, %v187_v46  ;;  %v1750_v36 = vrot.slane %v1719_v39, 6 }
  0xae   :  { %v216_v58 = vadd.f32 %v1728_v44, %v189_v45  ;;  %v238_v5 = vadd.f32 %v1715_v10, %v213_v48  ;;  %v1754_v10 = vrot.slane %v1719_v39, 7 }
  0xaf   :  { %v1395_v59 = vpop.eup %1394  ;;  %v239_v62 = vadd.f32 %v223_v16, %v214_v52  ;;  %v240_v63 = vadd.f32 %v224_v37, %v215_v53 }
  0xb0   :  { %v1397_v0 = vpop.eup %1396  ;;  %v191_v49 = vmul.f32 0.6931472, %v1395_v59  ;;  %v241_v1 = vadd.f32 %v225_v47, %v216_v58 }
  0xb1   :  { %v193_v4 = vmul.f32 0.6931472, %v1397_v0  ;;  %v262_v7 = vrot.slane %v239_v62, 7  ;;  %v265_v8 = vrot.slane %v240_v63, 6 }
  0xb2   :  { %v217_v12 = vadd.f32 %v1736_v55, %v191_v49  ;;  %v268_v16 = vrot.slane %v241_v1, 5 }
  0xb3   :  { %v1399_v13 = vpop.eup %1398  ;;  %v218_v14 = vadd.f32 %v1741_v61, %v193_v4  ;;  %v264_v15 = vsel %vm263_vm9, %v262_v7, %v238_v5 }
  0xb4   :  { %v1401_v27 = vpop.eup %1400  ;;  %v195_v28 = vmul.f32 0.6931472, %v1399_v13  ;;  %v242_v37 = vadd.f32 %v226_v54, %v217_v12  ;;  %v267_v41 = vsel %vm266_vm10, %v265_v8, %v264_v15 }
  0xb5   :  { %v197_v46 = vmul.f32 0.6931472, %v1401_v27  ;;  %v243_v45 = vadd.f32 %v227_v60, %v218_v14  ;;  %v270_v47 = vsel %vm269_vm11, %v268_v16, %v267_v41 }
  0xb6   :  { %v219_v48 = vadd.f32 %v1750_v36, %v195_v28  ;;  %v271_v52 = vrot.slane %v242_v37, 4 }
  0xb7   :  { %v220_v53 = vadd.f32 %v1754_v10, %v197_v46  ;;  %v274_v58 = vrot.slane %v243_v45, 3 }
  0xb8   :  { %v244_v59 = vadd.f32 %v228_v9, %v219_v48  ;;  %v273_v62 = vsel %vm272_vm12, %v271_v52, %v270_v47 }
  0xb9   :  { %v245_v54 = vadd.f32 %v229_v11, %v220_v53  ;;  %v276_v60 = vsel %vm275_vm13, %v274_v58, %v273_v62 }
  0xba   :  { %v277_v63 = vrot.slane %v244_v59, 2 }
  0xbb   :  { %v280_v0 = vrot.slane %v245_v54, 1 }
  0xbc   :  { %v279_v49 = vsel %vm278_vm14, %v277_v63, %v276_v60 }
  0xbd   :  { %v282_v1 = vsel %vm281_vm15, %v280_v0, %v279_v49 }
  0xbe   :  { %v1767_v4 = vsel %vm253_vm0, %v282_v1, %v1682_v40 }
  0xbf   :  { %v287_v5 = vrot.slane %v1767_v4, 4 }
  0xc1   :  { %v288_v7 = vmax.f32 %v1767_v4, %v287_v5 }
  0xc3   :  { %v289_v8 = vrot.slane %v288_v7, 2 }
  0xc5   :  { %v290_v9 = vmax.f32 %v288_v7, %v289_v8 }
  0xc7   :  { %v291_v11 = vrot.slane %v290_v9, 1 }
  0xc9   :  { %v1771_v12 = vmax.f32 %v290_v9, %v291_v11 }
  0xcb   :  { %v293_v18 = vsub.f32 %v1767_v4, %v1771_v12 }
  0xcd   :  { %v294_v21 = vmul.f32 1.442695, %v293_v18 }
  0xcf   :  { %1402 = vpow2.f32 %v294_v21 }
  0xd9   :  { %v1403_v13 = vpop.eup %1402 }
  0xda   :  { %v296_v14 = vmul.f32 %v1403_v13, %v1692_v51  ;;  %v297_v40 = vmul.f32 %v1403_v13, %v1690_v50  ;;  %v298_v15 = vmul.f32 %v1403_v13, %v1696_v56  ;;  %v299_v16 = vmul.f32 %v1403_v13, %v1698_v57 }
  0xdb   :  { %v300_v27 = vmul.f32 %v1403_v13, %v1702_v2  ;;  %v301_v28 = vmul.f32 %v1403_v13, %v1704_v3  ;;  %v302_v37 = vmul.f32 %v1403_v13, %v1708_v17  ;;  %v303_v41 = vmul.f32 %v1403_v13, %v1710_v26 }
  0xdc   :  { %v304_v46 = vrot.slane %v296_v14, 4  ;;  %v310_v45 = vrot.slane %v297_v40, 4  ;;  %v316_v47 = vrot.slane %v298_v15, 4  ;;  %v322_v48 = vrot.slane %v299_v16, 4 }
  0xdd   :  { %v328_v52 = vrot.slane %v300_v27, 4  ;;  %v334_v53 = vrot.slane %v301_v28, 4  ;;  %v340_v58 = vrot.slane %v302_v37, 4  ;;  %v346_v59 = vrot.slane %v303_v41, 4 }
  0xde   :  { %v305_v62 = vadd.f32 %v304_v46, %v296_v14  ;;  %v311_v54 = vadd.f32 %v310_v45, %v297_v40  ;;  %v317_v63 = vadd.f32 %v316_v47, %v298_v15  ;;  %v323_v60 = vadd.f32 %v322_v48, %v299_v16 }
  0xdf   :  { %v329_v0 = vadd.f32 %v328_v52, %v300_v27  ;;  %v335_v49 = vadd.f32 %v334_v53, %v301_v28  ;;  %v341_v1 = vadd.f32 %v340_v58, %v302_v37  ;;  %v347_v5 = vadd.f32 %v346_v59, %v303_v41 }
  0xe0   :  { %v306_v7 = vrot.slane %v305_v62, 2  ;;  %v312_v8 = vrot.slane %v311_v54, 2  ;;  %v318_v9 = vrot.slane %v317_v63, 2  ;;  %v324_v11 = vrot.slane %v323_v60, 2 }
  0xe1   :  { %v330_v18 = vrot.slane %v329_v0, 2  ;;  %v336_v21 = vrot.slane %v335_v49, 2  ;;  %v342_v13 = vrot.slane %v341_v1, 2  ;;  %v348_v38 = vrot.slane %v347_v5, 2 }
  0xe2   :  { %v307_v34 = vadd.f32 %v306_v7, %v305_v62  ;;  %v313_v33 = vadd.f32 %v312_v8, %v311_v54  ;;  %v319_v30 = vadd.f32 %v318_v9, %v317_v63  ;;  %v325_v25 = vadd.f32 %v324_v11, %v323_v60 }
  0xe3   :  { %v331_v14 = vadd.f32 %v330_v18, %v329_v0  ;;  %v337_v40 = vadd.f32 %v336_v21, %v335_v49  ;;  %v343_v15 = vadd.f32 %v342_v13, %v341_v1  ;;  %v349_v16 = vadd.f32 %v348_v38, %v347_v5  ;;  %v286_v38 = vld [vmem:[#allocation5 + $0x8] sm:$0xff] }
  0xe4   :  { %v308_v27 = vrot.slane %v307_v34, 1  ;;  %v314_v28 = vrot.slane %v313_v33, 1  ;;  %v320_v37 = vrot.slane %v319_v30, 1  ;;  %v326_v41 = vrot.slane %v325_v25, 1 }
  0xe5   :  { %v332_v46 = vrot.slane %v331_v14, 1  ;;  %v338_v45 = vrot.slane %v337_v40, 1  ;;  %v344_v53 = vrot.slane %v343_v15, 1  ;;  %v350_v59 = vrot.slane %v349_v16, 1 }
  0xe6   :  { %v309_v47 = vadd.f32 %v308_v27, %v307_v34  ;;  %v315_v48 = vadd.f32 %v314_v28, %v313_v33  ;;  %v321_v52 = vadd.f32 %v320_v37, %v319_v30  ;;  %v327_v58 = vadd.f32 %v326_v41, %v325_v25 }
  0xe7   :  { %v333_v62 = vadd.f32 %v332_v46, %v331_v14  ;;  %v339_v54 = vadd.f32 %v338_v45, %v337_v40  ;;  %v345_v63 = vadd.f32 %v344_v53, %v343_v15  ;;  %v351_v60 = vadd.f32 %v350_v59, %v349_v16 }
  0xe8   :  { %1404 = vlog2.f32 %v309_v47  ;;  %v376_v34 = vadd.f32 %v1771_v12, %v286_v38 }
  0xe9   :  { %1406 = vlog2.f32 %v315_v48 }
  0xea   :  { %1408 = vlog2.f32 %v321_v52  ;;  %v378_v8 = vrot.slane %v376_v34, 1  ;;  %v379_v21 = vrot.slane %v376_v34, 2  ;;  %v380_v13 = vrot.slane %v376_v34, 3 }
  0xeb   :  { %1410 = vlog2.f32 %v327_v58  ;;  %v381_v15 = vrot.slane %v376_v34, 4  ;;  %v382_v16 = vrot.slane %v376_v34, 5  ;;  %v383_v41 = vrot.slane %v376_v34, 6 }
  0xec   :  { %1412 = vlog2.f32 %v333_v62 }
  0xed   :  { %1414 = vlog2.f32 %v339_v54 }
  0xee   :  { %1416 = vlog2.f32 %v345_v63 }
  0xef   :  { %1418 = vlog2.f32 %v351_v60  ;;  %v384_v60 = vrot.slane %v376_v34, 7 }
  0xf2   :  { %v1405_v33 = vpop.eup %1404 }
  0xf3   :  { %v1407_v30 = vpop.eup %1406  ;;  %v353_v0 = vmul.f32 0.6931472, %v1405_v33 }
  0xf4   :  { %v1409_v25 = vpop.eup %1408  ;;  %v355_v49 = vmul.f32 0.6931472, %v1407_v30 }
  0xf5   :  { %v1411_v1 = vpop.eup %1410  ;;  %v357_v5 = vmul.f32 0.6931472, %v1409_v25  ;;  %v368_v7 = vadd.f32 %v353_v0, %v1719_v39 }
  0xf6   :  { %v1413_v9 = vpop.eup %1412  ;;  %v359_v11 = vmul.f32 0.6931472, %v1411_v1  ;;  %v369_v18 = vadd.f32 %v355_v49, %v1722_v42 }
  0xf7   :  { %v1415_v14 = vpop.eup %1414  ;;  %v361_v40 = vmul.f32 0.6931472, %v1413_v9  ;;  %v370_v12 = vadd.f32 %v357_v5, %v1725_v43  ;;  %v393_v52 = vadd.f32 %v376_v34, %v368_v7 }
  0xf8   :  { %v1417_v27 = vpop.eup %1416  ;;  %v363_v28 = vmul.f32 0.6931472, %v1415_v14  ;;  %v371_v37 = vadd.f32 %v359_v11, %v1728_v44  ;;  %v394_v46 = vadd.f32 %v378_v8, %v369_v18 }
  0xf9   :  { %v1419_v45 = vpop.eup %1418  ;;  %v365_v47 = vmul.f32 0.6931472, %v1417_v27  ;;  %v372_v48 = vadd.f32 %v361_v40, %v1736_v55  ;;  %v395_v53 = vadd.f32 %v379_v21, %v370_v12 }
  0xfa   :  { %v367_v58 = vmul.f32 0.6931472, %v1419_v45  ;;  %v373_v59 = vadd.f32 %v363_v28, %v1741_v61  ;;  %v396_v62 = vadd.f32 %v380_v13, %v371_v37  ;;  %v418_v54 = vrot.slane %v394_v46, 7 }
  0xfb   :  { %v374_v63 = vadd.f32 %v365_v47, %v1750_v36  ;;  %v397_v38 = vadd.f32 %v381_v15, %v372_v48  ;;  %v420_v33 = vrot.slane %v395_v53, 6 }
  0xfc   :  { %v375_v30 = vadd.f32 %v367_v58, %v1754_v10  ;;  %v398_v0 = vadd.f32 %v382_v16, %v373_v59  ;;  %v419_v25 = vsel %vm263_vm9, %v418_v54, %v393_v52  ;;  %v422_v49 = vrot.slane %v396_v62, 5 }
  0xfd   :  { %v399_v1 = vadd.f32 %v383_v41, %v374_v63  ;;  %v421_v5 = vsel %vm266_vm10, %v420_v33, %v419_v25  ;;  %v424_v7 = vrot.slane %v397_v38, 4 }
  0xfe   :  { %v400_v8 = vadd.f32 %v384_v60, %v375_v30  ;;  %v423_v9 = vsel %vm269_vm11, %v422_v49, %v421_v5  ;;  %v426_v11 = vrot.slane %v398_v0, 3 }
  0xff   :  { %v425_v18 = vsel %vm272_vm12, %v424_v7, %v423_v9  ;;  %v428_v21 = vrot.slane %v399_v1, 2 }
 0x100   :  { %v427_v34 = vsel %vm275_vm13, %v426_v11, %v425_v18  ;;  %v430_v13 = vrot.slane %v400_v8, 1 }
 0x101   :  { %v429_v14 = vsel %vm278_vm14, %v428_v21, %v427_v34 }
 0x102   :  { %v431_v40 = vsel %vm281_vm15, %v430_v13, %v429_v14 }
 0x103   :  { %v1803_v12 = vsel %vm409_vm1, %v431_v40, %v1767_v4 }
 0x104   :  { %v436_v15 = vrot.slane %v1803_v12, 4 }
 0x106   :  { %v437_v16 = vmax.f32 %v1803_v12, %v436_v15 }
 0x108   :  { %v438_v27 = vrot.slane %v437_v16, 2 }
 0x10a   :  { %v439_v28 = vmax.f32 %v437_v16, %v438_v27 }
 0x10c   :  { %v440_v37 = vrot.slane %v439_v28, 1 }
 0x10e   :  { %v1807_v41 = vmax.f32 %v439_v28, %v440_v37 }
 0x110   :  { %v442_v19 = vsub.f32 %v1803_v12, %v1807_v41 }
 0x112   :  { %v443_v22 = vmul.f32 1.442695, %v442_v19 }
 0x114   :  { %1420 = vpow2.f32 %v443_v22 }
 0x11e   :  { %v1421_v46 = vpop.eup %1420 }
 0x11f   :  { %v445_v45 = vmul.f32 %v1421_v46, %v1692_v51  ;;  %v446_v4 = vmul.f32 %v1421_v46, %v1690_v50  ;;  %v447_v47 = vmul.f32 %v1421_v46, %v1696_v56  ;;  %v448_v48 = vmul.f32 %v1421_v46, %v1698_v57 }
 0x120   :  { %v449_v52 = vmul.f32 %v1421_v46, %v1702_v2  ;;  %v450_v53 = vmul.f32 %v1421_v46, %v1704_v3  ;;  %v451_v58 = vmul.f32 %v1421_v46, %v1708_v17  ;;  %v452_v59 = vmul.f32 %v1421_v46, %v1710_v26 }
 0x121   :  { %v453_v62 = vrot.slane %v445_v45, 4  ;;  %v459_v54 = vrot.slane %v446_v4, 4  ;;  %v465_v63 = vrot.slane %v447_v47, 4  ;;  %v471_v60 = vrot.slane %v448_v48, 4 }
 0x122   :  { %v477_v38 = vrot.slane %v449_v52, 4  ;;  %v483_v33 = vrot.slane %v450_v53, 4  ;;  %v489_v30 = vrot.slane %v451_v58, 4  ;;  %v495_v0 = vrot.slane %v452_v59, 4 }
 0x123   :  { %v454_v25 = vadd.f32 %v453_v62, %v445_v45  ;;  %v460_v49 = vadd.f32 %v459_v54, %v446_v4  ;;  %v466_v1 = vadd.f32 %v465_v63, %v447_v47  ;;  %v472_v5 = vadd.f32 %v471_v60, %v448_v48 }
 0x124   :  { %v478_v7 = vadd.f32 %v477_v38, %v449_v52  ;;  %v484_v8 = vadd.f32 %v483_v33, %v450_v53  ;;  %v490_v9 = vadd.f32 %v489_v30, %v451_v58  ;;  %v496_v11 = vadd.f32 %v495_v0, %v452_v59 }
 0x125   :  { %v455_v18 = vrot.slane %v454_v25, 2  ;;  %v461_v21 = vrot.slane %v460_v49, 2  ;;  %v467_v34 = vrot.slane %v466_v1, 2  ;;  %v473_v13 = vrot.slane %v472_v5, 2 }
 0x126   :  { %v479_v14 = vrot.slane %v478_v7, 2  ;;  %v485_v40 = vrot.slane %v484_v8, 2  ;;  %v491_v15 = vrot.slane %v490_v9, 2  ;;  %v497_v16 = vrot.slane %v496_v11, 2 }
 0x127   :  { %v456_v27 = vadd.f32 %v455_v18, %v454_v25  ;;  %v462_v28 = vadd.f32 %v461_v21, %v460_v49  ;;  %v468_v37 = vadd.f32 %v467_v34, %v466_v1  ;;  %v474_v19 = vadd.f32 %v473_v13, %v472_v5  ;;  %v435_v1 = vld [vmem:[#allocation5 + $0x10] sm:$0xff] }
 0x128   :  { %v480_v22 = vadd.f32 %v479_v14, %v478_v7  ;;  %v486_v46 = vadd.f32 %v485_v40, %v484_v8  ;;  %v492_v45 = vadd.f32 %v491_v15, %v490_v9  ;;  %v498_v4 = vadd.f32 %v497_v16, %v496_v11 }
 0x129   :  { %v457_v47 = vrot.slane %v456_v27, 1  ;;  %v463_v48 = vrot.slane %v462_v28, 1  ;;  %v469_v52 = vrot.slane %v468_v37, 1  ;;  %v475_v53 = vrot.slane %v474_v19, 1 }
 0x12a   :  { %v481_v58 = vrot.slane %v480_v22, 1  ;;  %v487_v59 = vrot.slane %v486_v46, 1  ;;  %v493_v60 = vrot.slane %v492_v45, 1  ;;  %v499_v33 = vrot.slane %v498_v4, 1 }
 0x12b   :  { %v458_v62 = vadd.f32 %v457_v47, %v456_v27  ;;  %v464_v54 = vadd.f32 %v463_v48, %v462_v28  ;;  %v470_v63 = vadd.f32 %v469_v52, %v468_v37  ;;  %v476_v38 = vadd.f32 %v475_v53, %v474_v19 }
 0x12c   :  { %v482_v30 = vadd.f32 %v481_v58, %v480_v22  ;;  %v488_v0 = vadd.f32 %v487_v59, %v486_v46  ;;  %v494_v25 = vadd.f32 %v493_v60, %v492_v45  ;;  %v500_v49 = vadd.f32 %v499_v33, %v498_v4 }
 0x12d   :  { %1422 = vlog2.f32 %v458_v62  ;;  %v525_v5 = vadd.f32 %v1807_v41, %v435_v1 }
 0x12e   :  { %1424 = vlog2.f32 %v464_v54 }
 0x12f   :  { %1426 = vlog2.f32 %v470_v63  ;;  %v527_v14 = vrot.slane %v525_v5, 1  ;;  %v528_v27 = vrot.slane %v525_v5, 2  ;;  %v529_v28 = vrot.slane %v525_v5, 3 }
 0x130   :  { %1428 = vlog2.f32 %v476_v38  ;;  %v530_v22 = vrot.slane %v525_v5, 4  ;;  %v531_v46 = vrot.slane %v525_v5, 5  ;;  %v532_v48 = vrot.slane %v525_v5, 6 }
 0x131   :  { %1430 = vlog2.f32 %v482_v30 }
 0x132   :  { %1432 = vlog2.f32 %v488_v0  ;;  %v533_v0 = vrot.slane %v525_v5, 7 }
 0x133   :  { %1434 = vlog2.f32 %v494_v25 }
 0x134   :  { %1436 = vlog2.f32 %v500_v49 }
 0x137   :  { %v1423_v7 = vpop.eup %1422 }
 0x138   :  { %v1425_v8 = vpop.eup %1424  ;;  %v502_v9 = vmul.f32 0.6931472, %v1423_v7 }
 0x139   :  { %v1427_v11 = vpop.eup %1426  ;;  %v504_v18 = vmul.f32 0.6931472, %v1425_v8 }
 0x13a   :  { %v1429_v21 = vpop.eup %1428  ;;  %v506_v34 = vmul.f32 0.6931472, %v1427_v11  ;;  %v517_v13 = vadd.f32 %v502_v9, %v1719_v39 }
 0x13b   :  { %v1431_v40 = vpop.eup %1430  ;;  %v508_v15 = vmul.f32 0.6931472, %v1429_v21  ;;  %v518_v16 = vadd.f32 %v504_v18, %v1722_v42 }
 0x13c   :  { %v1433_v37 = vpop.eup %1432  ;;  %v510_v19 = vmul.f32 0.6931472, %v1431_v40  ;;  %v519_v41 = vadd.f32 %v506_v34, %v1725_v43  ;;  %v542_v62 = vadd.f32 %v525_v5, %v517_v13 }
 0x13d   :  { %v1435_v45 = vpop.eup %1434  ;;  %v512_v4 = vmul.f32 0.6931472, %v1433_v37  ;;  %v520_v47 = vadd.f32 %v508_v15, %v1728_v44  ;;  %v543_v52 = vadd.f32 %v527_v14, %v518_v16 }
 0x13e   :  { %v1437_v53 = vpop.eup %1436  ;;  %v514_v58 = vmul.f32 0.6931472, %v1435_v45  ;;  %v521_v59 = vadd.f32 %v510_v19, %v1736_v55  ;;  %v544_v54 = vadd.f32 %v528_v27, %v519_v41 }
 0x13f   :  { %v516_v63 = vmul.f32 0.6931472, %v1437_v53  ;;  %v522_v60 = vadd.f32 %v512_v4, %v1741_v61  ;;  %v545_v38 = vadd.f32 %v529_v28, %v520_v47  ;;  %v567_v33 = vrot.slane %v543_v52, 7 }
 0x140   :  { %v523_v30 = vadd.f32 %v514_v58, %v1750_v36  ;;  %v546_v25 = vadd.f32 %v530_v22, %v521_v59  ;;  %v569_v49 = vrot.slane %v544_v54, 6 }
 0x141   :  { %v524_v1 = vadd.f32 %v516_v63, %v1754_v10  ;;  %v547_v7 = vadd.f32 %v531_v46, %v522_v60  ;;  %v568_v8 = vsel %vm263_vm9, %v567_v33, %v542_v62  ;;  %v571_v9 = vrot.slane %v545_v38, 5 }
 0x142   :  { %v548_v11 = vadd.f32 %v532_v48, %v523_v30  ;;  %v570_v18 = vsel %vm266_vm10, %v569_v49, %v568_v8  ;;  %v573_v21 = vrot.slane %v546_v25, 4 }
 0x143   :  { %v549_v34 = vadd.f32 %v533_v0, %v524_v1  ;;  %v572_v13 = vsel %vm269_vm11, %v571_v9, %v570_v18  ;;  %v575_v14 = vrot.slane %v547_v7, 3 }
 0x144   :  { %v574_v40 = vsel %vm272_vm12, %v573_v21, %v572_v13  ;;  %v577_v15 = vrot.slane %v548_v11, 2 }
 0x145   :  { %v576_v5 = vsel %vm275_vm13, %v575_v14, %v574_v40  ;;  %v579_v16 = vrot.slane %v549_v34, 1 }
 0x146   :  { %v578_v27 = vsel %vm278_vm14, %v577_v15, %v576_v5 }
 0x147   :  { %v580_v28 = vsel %vm281_vm15, %v579_v16, %v578_v27 }
 0x148   :  { %v1839_v37 = vsel %vm558_vm2, %v580_v28, %v1803_v12 }
 0x149   :  { %v585_v19 = vrot.slane %v1839_v37, 4 }
 0x14b   :  { %v586_v41 = vmax.f32 %v1839_v37, %v585_v19 }
 0x14d   :  { %v587_v22 = vrot.slane %v586_v41, 2 }
 0x14f   :  { %v588_v46 = vmax.f32 %v586_v41, %v587_v22 }
 0x151   :  { %v589_v45 = vrot.slane %v588_v46, 1 }
 0x153   :  { %v1843_v4 = vmax.f32 %v588_v46, %v589_v45 }
 0x155   :  { %v591_v20 = vsub.f32 %v1839_v37, %v1843_v4 }
 0x157   :  { %v592_v23 = vmul.f32 1.442695, %v591_v20 }
 0x159   :  { %1438 = vpow2.f32 %v592_v23 }
 0x163   :  { %v1439_v47 = vpop.eup %1438 }
 0x164   :  { %v594_v48 = vmul.f32 %v1439_v47, %v1692_v51  ;;  %v595_v12 = vmul.f32 %v1439_v47, %v1690_v50  ;;  %v596_v52 = vmul.f32 %v1439_v47, %v1696_v56  ;;  %v597_v53 = vmul.f32 %v1439_v47, %v1698_v57 }
 0x165   :  { %v598_v58 = vmul.f32 %v1439_v47, %v1702_v2  ;;  %v599_v59 = vmul.f32 %v1439_v47, %v1704_v3  ;;  %v600_v62 = vmul.f32 %v1439_v47, %v1708_v17  ;;  %v601_v54 = vmul.f32 %v1439_v47, %v1710_v26 }
 0x166   :  { %v602_v63 = vrot.slane %v594_v48, 4  ;;  %v608_v60 = vrot.slane %v595_v12, 4  ;;  %v614_v38 = vrot.slane %v596_v52, 4  ;;  %v620_v33 = vrot.slane %v597_v53, 4 }
 0x167   :  { %v626_v30 = vrot.slane %v598_v58, 4  ;;  %v632_v0 = vrot.slane %v599_v59, 4  ;;  %v638_v25 = vrot.slane %v600_v62, 4  ;;  %v644_v49 = vrot.slane %v601_v54, 4 }
 0x168   :  { %v603_v1 = vadd.f32 %v602_v63, %v594_v48  ;;  %v609_v7 = vadd.f32 %v608_v60, %v595_v12  ;;  %v615_v8 = vadd.f32 %v614_v38, %v596_v52  ;;  %v621_v9 = vadd.f32 %v620_v33, %v597_v53 }
 0x169   :  { %v627_v11 = vadd.f32 %v626_v30, %v598_v58  ;;  %v633_v18 = vadd.f32 %v632_v0, %v599_v59  ;;  %v639_v21 = vadd.f32 %v638_v25, %v600_v62  ;;  %v645_v34 = vadd.f32 %v644_v49, %v601_v54 }
 0x16a   :  { %v604_v13 = vrot.slane %v603_v1, 2  ;;  %v610_v14 = vrot.slane %v609_v7, 2  ;;  %v616_v40 = vrot.slane %v615_v8, 2  ;;  %v622_v15 = vrot.slane %v621_v9, 2 }
 0x16b   :  { %v628_v5 = vrot.slane %v627_v11, 2  ;;  %v634_v16 = vrot.slane %v633_v18, 2  ;;  %v640_v27 = vrot.slane %v639_v21, 2  ;;  %v646_v28 = vrot.slane %v645_v34, 2 }
 0x16c   :  { %v605_v19 = vadd.f32 %v604_v13, %v603_v1  ;;  %v611_v41 = vadd.f32 %v610_v14, %v609_v7  ;;  %v617_v22 = vadd.f32 %v616_v40, %v615_v8  ;;  %v623_v46 = vadd.f32 %v622_v15, %v621_v9  ;;  %v584_v1 = vld [vmem:[#allocation5 + $0x18] sm:$0xff] }
 0x16d   :  { %v629_v45 = vadd.f32 %v628_v5, %v627_v11  ;;  %v635_v20 = vadd.f32 %v634_v16, %v633_v18  ;;  %v641_v23 = vadd.f32 %v640_v27, %v639_v21  ;;  %v647_v47 = vadd.f32 %v646_v28, %v645_v34 }
 0x16e   :  { %v606_v48 = vrot.slane %v605_v19, 1  ;;  %v612_v12 = vrot.slane %v611_v41, 1  ;;  %v618_v52 = vrot.slane %v617_v22, 1  ;;  %v624_v53 = vrot.slane %v623_v46, 1 }
 0x16f   :  { %v630_v58 = vrot.slane %v629_v45, 1  ;;  %v636_v59 = vrot.slane %v635_v20, 1  ;;  %v642_v60 = vrot.slane %v641_v23, 1  ;;  %v648_v33 = vrot.slane %v647_v47, 1 }
 0x170   :  { %v607_v62 = vadd.f32 %v606_v48, %v605_v19  ;;  %v613_v54 = vadd.f32 %v612_v12, %v611_v41  ;;  %v619_v63 = vadd.f32 %v618_v52, %v617_v22  ;;  %v625_v38 = vadd.f32 %v624_v53, %v623_v46 }
 0x171   :  { %v631_v30 = vadd.f32 %v630_v58, %v629_v45  ;;  %v637_v0 = vadd.f32 %v636_v59, %v635_v20  ;;  %v643_v25 = vadd.f32 %v642_v60, %v641_v23  ;;  %v649_v49 = vadd.f32 %v648_v33, %v647_v47 }
 0x172   :  { %1440 = vlog2.f32 %v607_v62  ;;  %v674_v7 = vadd.f32 %v1843_v4, %v584_v1 }
 0x173   :  { %1442 = vlog2.f32 %v613_v54 }
 0x174   :  { %1444 = vlog2.f32 %v619_v63  ;;  %v676_v40 = vrot.slane %v674_v7, 1  ;;  %v677_v27 = vrot.slane %v674_v7, 2  ;;  %v678_v28 = vrot.slane %v674_v7, 3 }
 0x175   :  { %1446 = vlog2.f32 %v625_v38  ;;  %v679_v22 = vrot.slane %v674_v7, 4  ;;  %v680_v46 = vrot.slane %v674_v7, 5  ;;  %v681_v47 = vrot.slane %v674_v7, 6 }
 0x176   :  { %1448 = vlog2.f32 %v631_v30  ;;  %v682_v33 = vrot.slane %v674_v7, 7 }
 0x177   :  { %1450 = vlog2.f32 %v637_v0 }
 0x178   :  { %1452 = vlog2.f32 %v643_v25 }
 0x179   :  { %1454 = vlog2.f32 %v649_v49 }
 0x17c   :  { %v1441_v8 = vpop.eup %1440 }
 0x17d   :  { %v1443_v9 = vpop.eup %1442  ;;  %v651_v11 = vmul.f32 0.6931472, %v1441_v8 }
 0x17e   :  { %v1445_v18 = vpop.eup %1444  ;;  %v653_v21 = vmul.f32 0.6931472, %v1443_v9 }
 0x17f   :  { %v1447_v34 = vpop.eup %1446  ;;  %v655_v13 = vmul.f32 0.6931472, %v1445_v18  ;;  %v666_v14 = vadd.f32 %v651_v11, %v1719_v39 }
 0x180   :  { %v1449_v15 = vpop.eup %1448  ;;  %v657_v5 = vmul.f32 0.6931472, %v1447_v34  ;;  %v667_v16 = vadd.f32 %v653_v21, %v1722_v42 }
 0x181   :  { %v1451_v19 = vpop.eup %1450  ;;  %v659_v41 = vmul.f32 0.6931472, %v1449_v15  ;;  %v668_v4 = vadd.f32 %v655_v13, %v1725_v43  ;;  %v691_v58 = vadd.f32 %v674_v7, %v666_v14  ;;  %v2041_v7 = vrot.slane %v1659_v24, %v1641_v6 }
 0x182   :  { %v1453_v45 = vpop.eup %1452  ;;  %v661_v20 = vmul.f32 0.6931472, %v1451_v19  ;;  %v669_v23 = vadd.f32 %v657_v5, %v1728_v44  ;;  %v692_v48 = vadd.f32 %v676_v40, %v667_v16 }
 0x183   :  { %v1455_v12 = vpop.eup %1454  ;;  %v663_v52 = vmul.f32 0.6931472, %v1453_v45  ;;  %v670_v53 = vadd.f32 %v659_v41, %v1736_v55  ;;  %v693_v59 = vadd.f32 %v677_v27, %v668_v4  ;;  %vm707_vm3 = vcmp.eq.s32.totalorder %v2041_v7, 1 }
 0x184   :  { %v665_v62 = vmul.f32 0.6931472, %v1455_v12  ;;  %v671_v54 = vadd.f32 %v661_v20, %v1741_v61  ;;  %v694_v63 = vadd.f32 %v678_v28, %v669_v23  ;;  %v716_v60 = vrot.slane %v692_v48, 7 }
 0x185   :  { %v672_v38 = vadd.f32 %v663_v52, %v1750_v36  ;;  %v695_v30 = vadd.f32 %v679_v22, %v670_v53  ;;  %v718_v0 = vrot.slane %v693_v59, 6 }
 0x186   :  { %v673_v25 = vadd.f32 %v665_v62, %v1754_v10  ;;  %v696_v49 = vadd.f32 %v680_v46, %v671_v54  ;;  %v717_v1 = vsel %vm263_vm9, %v716_v60, %v691_v58  ;;  %v720_v8 = vrot.slane %v694_v63, 5 }
 0x187   :  { %v697_v9 = vadd.f32 %v681_v47, %v672_v38  ;;  %v719_v11 = vsel %vm266_vm10, %v718_v0, %v717_v1  ;;  %v722_v18 = vrot.slane %v695_v30, 4 }
 0x188   :  { %v698_v21 = vadd.f32 %v682_v33, %v673_v25  ;;  %v721_v34 = vsel %vm269_vm11, %v720_v8, %v719_v11  ;;  %v724_v13 = vrot.slane %v696_v49, 3 }
 0x189   :  { %v723_v14 = vsel %vm272_vm12, %v722_v18, %v721_v34  ;;  %v726_v40 = vrot.slane %v697_v9, 2 }
 0x18a   :  { %v725_v15 = vsel %vm275_vm13, %v724_v13, %v723_v14  ;;  %v728_v5 = vrot.slane %v698_v21, 1 }
 0x18b   :  { %v727_v16 = vsel %vm278_vm14, %v726_v40, %v725_v15 }
 0x18c   :  { %v729_v27 = vsel %vm281_vm15, %v728_v5, %v727_v16 }
 0x18d   :  { %v1875_v28 = vsel %vm707_vm3, %v729_v27, %v1839_v37 }
 0x18e   :  { %v734_v19 = vrot.slane %v1875_v28, 4 }
 0x190   :  { %v735_v41 = vmax.f32 %v1875_v28, %v734_v19 }
 0x192   :  { %v736_v4 = vrot.slane %v735_v41, 2 }
 0x194   :  { %v737_v22 = vmax.f32 %v735_v41, %v736_v4 }
 0x196   :  { %v738_v46 = vrot.slane %v737_v22, 1 }
 0x198   :  { %v1879_v45 = vmax.f32 %v737_v22, %v738_v46 }
 0x19a   :  { %v740_v24 = vsub.f32 %v1875_v28, %v1879_v45 }
 0x19c   :  { %v741_v20 = vmul.f32 1.442695, %v740_v24 }
 0x19e   :  { %1456 = vpow2.f32 %v741_v20 }
 0x1a8   :  { %v1457_v23 = vpop.eup %1456 }
 0x1a9   :  { %v743_v47 = vmul.f32 %v1457_v23, %v1692_v51  ;;  %v744_v37 = vmul.f32 %v1457_v23, %v1690_v50  ;;  %v745_v48 = vmul.f32 %v1457_v23, %v1696_v56  ;;  %v746_v12 = vmul.f32 %v1457_v23, %v1698_v57 }
 0x1aa   :  { %v747_v52 = vmul.f32 %v1457_v23, %v1702_v2  ;;  %v748_v53 = vmul.f32 %v1457_v23, %v1704_v3  ;;  %v749_v58 = vmul.f32 %v1457_v23, %v1708_v17  ;;  %v750_v59 = vmul.f32 %v1457_v23, %v1710_v26 }
 0x1ab   :  { %v751_v62 = vrot.slane %v743_v47, 4  ;;  %v757_v54 = vrot.slane %v744_v37, 4  ;;  %v763_v63 = vrot.slane %v745_v48, 4  ;;  %v769_v60 = vrot.slane %v746_v12, 4 }
 0x1ac   :  { %v775_v38 = vrot.slane %v747_v52, 4  ;;  %v781_v33 = vrot.slane %v748_v53, 4  ;;  %v787_v30 = vrot.slane %v749_v58, 4  ;;  %v793_v0 = vrot.slane %v750_v59, 4 }
 0x1ad   :  { %v752_v25 = vadd.f32 %v751_v62, %v743_v47  ;;  %v758_v49 = vadd.f32 %v757_v54, %v744_v37  ;;  %v764_v1 = vadd.f32 %v763_v63, %v745_v48  ;;  %v770_v8 = vadd.f32 %v769_v60, %v746_v12 }
 0x1ae   :  { %v776_v9 = vadd.f32 %v775_v38, %v747_v52  ;;  %v782_v11 = vadd.f32 %v781_v33, %v748_v53  ;;  %v788_v18 = vadd.f32 %v787_v30, %v749_v58  ;;  %v794_v21 = vadd.f32 %v793_v0, %v750_v59  ;;  %v733_v0 = vld [vmem:[#allocation5 + $0x20] sm:$0xff] }
 0x1af   :  { %v753_v34 = vrot.slane %v752_v25, 2  ;;  %v759_v13 = vrot.slane %v758_v49, 2  ;;  %v765_v14 = vrot.slane %v764_v1, 2  ;;  %v771_v40 = vrot.slane %v770_v8, 2 }
 0x1b0   :  { %v777_v7 = vrot.slane %v776_v9, 2  ;;  %v783_v15 = vrot.slane %v782_v11, 2  ;;  %v789_v5 = vrot.slane %v788_v18, 2  ;;  %v795_v16 = vrot.slane %v794_v21, 2 }
 0x1b1   :  { %v754_v27 = vadd.f32 %v753_v34, %v752_v25  ;;  %v760_v19 = vadd.f32 %v759_v13, %v758_v49  ;;  %v766_v41 = vadd.f32 %v765_v14, %v764_v1  ;;  %v772_v4 = vadd.f32 %v771_v40, %v770_v8 }
 0x1b2   :  { %v778_v22 = vadd.f32 %v777_v7, %v776_v9  ;;  %v784_v46 = vadd.f32 %v783_v15, %v782_v11  ;;  %v790_v24 = vadd.f32 %v789_v5, %v788_v18  ;;  %v796_v20 = vadd.f32 %v795_v16, %v794_v21 }
 0x1b3   :  { %v755_v23 = vrot.slane %v754_v27, 1  ;;  %v761_v47 = vrot.slane %v760_v19, 1  ;;  %v767_v37 = vrot.slane %v766_v41, 1  ;;  %v773_v48 = vrot.slane %v772_v4, 1 }
 0x1b4   :  { %v779_v12 = vrot.slane %v778_v22, 1  ;;  %v785_v52 = vrot.slane %v784_v46, 1  ;;  %v791_v62 = vrot.slane %v790_v24, 1  ;;  %v797_v63 = vrot.slane %v796_v20, 1 }
 0x1b5   :  { %v756_v53 = vadd.f32 %v755_v23, %v754_v27  ;;  %v762_v58 = vadd.f32 %v761_v47, %v760_v19  ;;  %v768_v59 = vadd.f32 %v767_v37, %v766_v41  ;;  %v774_v54 = vadd.f32 %v773_v48, %v772_v4 }
 0x1b6   :  { %v780_v60 = vadd.f32 %v779_v12, %v778_v22  ;;  %v786_v38 = vadd.f32 %v785_v52, %v784_v46  ;;  %v792_v33 = vadd.f32 %v791_v62, %v790_v24  ;;  %v798_v30 = vadd.f32 %v797_v63, %v796_v20 }
 0x1b7   :  { %1458 = vlog2.f32 %v756_v53  ;;  %v823_v25 = vadd.f32 %v1879_v45, %v733_v0 }
 0x1b8   :  { %1460 = vlog2.f32 %v762_v58 }
 0x1b9   :  { %1462 = vlog2.f32 %v768_v59  ;;  %v825_v13 = vrot.slane %v823_v25, 1  ;;  %v826_v15 = vrot.slane %v823_v25, 2  ;;  %v827_v5 = vrot.slane %v823_v25, 3 }
 0x1ba   :  { %1464 = vlog2.f32 %v774_v54  ;;  %v828_v19 = vrot.slane %v823_v25, 4  ;;  %v829_v41 = vrot.slane %v823_v25, 5  ;;  %v830_v24 = vrot.slane %v823_v25, 6 }
 0x1bb   :  { %1466 = vlog2.f32 %v780_v60  ;;  %v831_v54 = vrot.slane %v823_v25, 7 }
 0x1bc   :  { %1468 = vlog2.f32 %v786_v38 }
 0x1bd   :  { %1470 = vlog2.f32 %v792_v33 }
 0x1be   :  { %1472 = vlog2.f32 %v798_v30 }
 0x1c1   :  { %v1459_v49 = vpop.eup %1458 }
 0x1c2   :  { %v1461_v1 = vpop.eup %1460  ;;  %v800_v8 = vmul.f32 0.6931472, %v1459_v49 }
 0x1c3   :  { %v1463_v9 = vpop.eup %1462  ;;  %v802_v11 = vmul.f32 0.6931472, %v1461_v1 }
 0x1c4   :  { %v1465_v18 = vpop.eup %1464  ;;  %v804_v21 = vmul.f32 0.6931472, %v1463_v9  ;;  %v815_v34 = vadd.f32 %v800_v8, %v1719_v39 }
 0x1c5   :  { %v1467_v14 = vpop.eup %1466  ;;  %v806_v40 = vmul.f32 0.6931472, %v1465_v18  ;;  %v816_v7 = vadd.f32 %v802_v11, %v1722_v42 }
 0x1c6   :  { %v1469_v16 = vpop.eup %1468  ;;  %v808_v27 = vmul.f32 0.6931472, %v1467_v14  ;;  %v817_v45 = vadd.f32 %v804_v21, %v1725_v43  ;;  %v840_v48 = vadd.f32 %v823_v25, %v815_v34  ;;  %v2042_v25 = vrot.slane %v1663_v29, %v1641_v6 }
 0x1c7   :  { %v1471_v4 = vpop.eup %1470  ;;  %v810_v22 = vmul.f32 0.6931472, %v1469_v16  ;;  %v818_v46 = vadd.f32 %v806_v40, %v1728_v44  ;;  %v841_v20 = vadd.f32 %v825_v13, %v816_v7 }
 0x1c8   :  { %v1473_v23 = vpop.eup %1472  ;;  %v812_v47 = vmul.f32 0.6931472, %v1471_v4  ;;  %v819_v37 = vadd.f32 %v808_v27, %v1736_v55  ;;  %v842_v12 = vadd.f32 %v826_v15, %v817_v45  ;;  %vm856_vm4 = vcmp.eq.s32.totalorder %v2042_v25, 1 }
 0x1c9   :  { %v814_v52 = vmul.f32 0.6931472, %v1473_v23  ;;  %v820_v53 = vadd.f32 %v810_v22, %v1741_v61  ;;  %v843_v58 = vadd.f32 %v827_v5, %v818_v46  ;;  %v865_v59 = vrot.slane %v841_v20, 7 }
 0x1ca   :  { %v821_v62 = vadd.f32 %v812_v47, %v1750_v36  ;;  %v844_v63 = vadd.f32 %v828_v19, %v819_v37  ;;  %v867_v60 = vrot.slane %v842_v12, 6 }
 0x1cb   :  { %v822_v38 = vadd.f32 %v814_v52, %v1754_v10  ;;  %v845_v33 = vadd.f32 %v829_v41, %v820_v53  ;;  %v866_v30 = vsel %vm263_vm9, %v865_v59, %v840_v48  ;;  %v869_v0 = vrot.slane %v843_v58, 5 }
 0x1cc   :  { %v846_v49 = vadd.f32 %v830_v24, %v821_v62  ;;  %v868_v1 = vsel %vm266_vm10, %v867_v60, %v866_v30  ;;  %v871_v8 = vrot.slane %v844_v63, 4 }
 0x1cd   :  { %v847_v9 = vadd.f32 %v831_v54, %v822_v38  ;;  %v870_v11 = vsel %vm269_vm11, %v869_v0, %v868_v1  ;;  %v873_v18 = vrot.slane %v845_v33, 3 }
 0x1ce   :  { %v872_v21 = vsel %vm272_vm12, %v871_v8, %v870_v11  ;;  %v875_v34 = vrot.slane %v846_v49, 2 }
 0x1cf   :  { %v874_v13 = vsel %vm275_vm13, %v873_v18, %v872_v21  ;;  %v877_v14 = vrot.slane %v847_v9, 1 }
 0x1d0   :  { %v876_v40 = vsel %vm278_vm14, %v875_v34, %v874_v13 }
 0x1d1   :  { %v878_v7 = vsel %vm281_vm15, %v877_v14, %v876_v40 }
 0x1d2   :  { %v1911_v15 = vsel %vm856_vm4, %v878_v7, %v1875_v28 }
 0x1d3   :  { %v883_v5 = vrot.slane %v1911_v15, 4 }
 0x1d5   :  { %v884_v16 = vmax.f32 %v1911_v15, %v883_v5 }
 0x1d7   :  { %v885_v27 = vrot.slane %v884_v16, 2 }
 0x1d9   :  { %v886_v45 = vmax.f32 %v884_v16, %v885_v27 }
 0x1db   :  { %v887_v19 = vrot.slane %v886_v45, 1 }
 0x1dd   :  { %v1915_v41 = vmax.f32 %v886_v45, %v887_v19 }
 0x1df   :  { %v889_v29 = vsub.f32 %v1911_v15, %v1915_v41 }
 0x1e1   :  { %v890_v4 = vmul.f32 1.442695, %v889_v29 }
 0x1e3   :  { %1474 = vpow2.f32 %v890_v4 }
 0x1ed   :  { %v1475_v22 = vpop.eup %1474 }
 0x1ee   :  { %v892_v46 = vmul.f32 %v1475_v22, %v1692_v51  ;;  %v893_v28 = vmul.f32 %v1475_v22, %v1690_v50  ;;  %v894_v24 = vmul.f32 %v1475_v22, %v1696_v56  ;;  %v895_v20 = vmul.f32 %v1475_v22, %v1698_v57 }
 0x1ef   :  { %v896_v23 = vmul.f32 %v1475_v22, %v1702_v2  ;;  %v897_v47 = vmul.f32 %v1475_v22, %v1704_v3  ;;  %v898_v37 = vmul.f32 %v1475_v22, %v1708_v17  ;;  %v899_v48 = vmul.f32 %v1475_v22, %v1710_v26 }
 0x1f0   :  { %v900_v12 = vrot.slane %v892_v46, 4  ;;  %v906_v52 = vrot.slane %v893_v28, 4  ;;  %v912_v53 = vrot.slane %v894_v24, 4  ;;  %v918_v58 = vrot.slane %v895_v20, 4 }
 0x1f1   :  { %v924_v59 = vrot.slane %v896_v23, 4  ;;  %v930_v62 = vrot.slane %v897_v47, 4  ;;  %v936_v54 = vrot.slane %v898_v37, 4  ;;  %v942_v63 = vrot.slane %v899_v48, 4 }
 0x1f2   :  { %v901_v60 = vadd.f32 %v900_v12, %v892_v46  ;;  %v907_v38 = vadd.f32 %v906_v52, %v893_v28  ;;  %v913_v33 = vadd.f32 %v912_v53, %v894_v24  ;;  %v919_v30 = vadd.f32 %v918_v58, %v895_v20 }
 0x1f3   :  { %v925_v0 = vadd.f32 %v924_v59, %v896_v23  ;;  %v931_v49 = vadd.f32 %v930_v62, %v897_v47  ;;  %v937_v1 = vadd.f32 %v936_v54, %v898_v37  ;;  %v943_v8 = vadd.f32 %v942_v63, %v899_v48  ;;  %v882_v54 = vld [vmem:[#allocation5 + $0x28] sm:$0xff] }
 0x1f4   :  { %v902_v9 = vrot.slane %v901_v60, 2  ;;  %v908_v11 = vrot.slane %v907_v38, 2  ;;  %v914_v18 = vrot.slane %v913_v33, 2  ;;  %v920_v21 = vrot.slane %v919_v30, 2 }
 0x1f5   :  { %v926_v34 = vrot.slane %v925_v0, 2  ;;  %v932_v25 = vrot.slane %v931_v49, 2  ;;  %v938_v13 = vrot.slane %v937_v1, 2  ;;  %v944_v14 = vrot.slane %v943_v8, 2 }
 0x1f6   :  { %v903_v40 = vadd.f32 %v902_v9, %v901_v60  ;;  %v909_v7 = vadd.f32 %v908_v11, %v907_v38  ;;  %v915_v5 = vadd.f32 %v914_v18, %v913_v33  ;;  %v921_v16 = vadd.f32 %v920_v21, %v919_v30 }
 0x1f7   :  { %v927_v27 = vadd.f32 %v926_v34, %v925_v0  ;;  %v933_v45 = vadd.f32 %v932_v25, %v931_v49  ;;  %v939_v19 = vadd.f32 %v938_v13, %v937_v1  ;;  %v945_v29 = vadd.f32 %v944_v14, %v943_v8 }
 0x1f8   :  { %v904_v4 = vrot.slane %v903_v40, 1  ;;  %v910_v22 = vrot.slane %v909_v7, 1  ;;  %v916_v46 = vrot.slane %v915_v5, 1  ;;  %v922_v28 = vrot.slane %v921_v16, 1 }
 0x1f9   :  { %v928_v24 = vrot.slane %v927_v27, 1  ;;  %v934_v20 = vrot.slane %v933_v45, 1  ;;  %v940_v48 = vrot.slane %v939_v19, 1  ;;  %v946_v52 = vrot.slane %v945_v29, 1 }
 0x1fa   :  { %v905_v23 = vadd.f32 %v904_v4, %v903_v40  ;;  %v911_v47 = vadd.f32 %v910_v22, %v909_v7  ;;  %v917_v37 = vadd.f32 %v916_v46, %v915_v5  ;;  %v923_v12 = vadd.f32 %v922_v28, %v921_v16 }
 0x1fb   :  { %v929_v53 = vadd.f32 %v928_v24, %v927_v27  ;;  %v935_v58 = vadd.f32 %v934_v20, %v933_v45  ;;  %v941_v59 = vadd.f32 %v940_v48, %v939_v19  ;;  %v947_v62 = vadd.f32 %v946_v52, %v945_v29 }
 0x1fc   :  { %1476 = vlog2.f32 %v905_v23  ;;  %v972_v63 = vadd.f32 %v1915_v41, %v882_v54 }
 0x1fd   :  { %1478 = vlog2.f32 %v911_v47 }
 0x1fe   :  { %1480 = vlog2.f32 %v917_v37  ;;  %v974_v9 = vrot.slane %v972_v63, 1  ;;  %v975_v34 = vrot.slane %v972_v63, 2  ;;  %v976_v25 = vrot.slane %v972_v63, 3 }
 0x1ff   :  { %1482 = vlog2.f32 %v923_v12  ;;  %v977_v40 = vrot.slane %v972_v63, 4  ;;  %v978_v7 = vrot.slane %v972_v63, 5  ;;  %v979_v45 = vrot.slane %v972_v63, 6 }
 0x200   :  { %1484 = vlog2.f32 %v929_v53  ;;  %v980_v48 = vrot.slane %v972_v63, 7 }
 0x201   :  { %1486 = vlog2.f32 %v935_v58 }
 0x202   :  { %1488 = vlog2.f32 %v941_v59 }
 0x203   :  { %1490 = vlog2.f32 %v947_v62 }
 0x206   :  { %v1477_v60 = vpop.eup %1476 }
 0x207   :  { %v1479_v38 = vpop.eup %1478  ;;  %v949_v33 = vmul.f32 0.6931472, %v1477_v60 }
 0x208   :  { %v1481_v30 = vpop.eup %1480  ;;  %v951_v0 = vmul.f32 0.6931472, %v1479_v38 }
 0x209   :  { %v1483_v49 = vpop.eup %1482  ;;  %v953_v1 = vmul.f32 0.6931472, %v1481_v30  ;;  %v964_v8 = vadd.f32 %v949_v33, %v1719_v39 }
 0x20a   :  { %v1485_v11 = vpop.eup %1484  ;;  %v955_v18 = vmul.f32 0.6931472, %v1483_v49  ;;  %v965_v21 = vadd.f32 %v951_v0, %v1722_v42 }
 0x20b   :  { %v1487_v13 = vpop.eup %1486  ;;  %v957_v14 = vmul.f32 0.6931472, %v1485_v11  ;;  %v966_v41 = vadd.f32 %v953_v1, %v1725_v43  ;;  %v989_v46 = vadd.f32 %v972_v63, %v964_v8  ;;  %v2043_v63 = vrot.slane %v1667_v31, %v1641_v6 }
 0x20c   :  { %v1489_v5 = vpop.eup %1488  ;;  %v959_v16 = vmul.f32 0.6931472, %v1487_v13  ;;  %v967_v27 = vadd.f32 %v955_v18, %v1728_v44  ;;  %v990_v19 = vadd.f32 %v974_v9, %v965_v21 }
 0x20d   :  { %v1491_v29 = vpop.eup %1490  ;;  %v961_v4 = vmul.f32 0.6931472, %v1489_v5  ;;  %v968_v22 = vadd.f32 %v957_v14, %v1736_v55  ;;  %v991_v28 = vadd.f32 %v975_v34, %v966_v41  ;;  %vm1005_vm5 = vcmp.eq.s32.totalorder %v2043_v63, 1 }
 0x20e   :  { %v963_v24 = vmul.f32 0.6931472, %v1491_v29  ;;  %v969_v20 = vadd.f32 %v959_v16, %v1741_v61  ;;  %v992_v23 = vadd.f32 %v976_v25, %v967_v27  ;;  %v1014_v47 = vrot.slane %v990_v19, 7 }
 0x20f   :  { %v970_v37 = vadd.f32 %v961_v4, %v1750_v36  ;;  %v993_v12 = vadd.f32 %v977_v40, %v968_v22  ;;  %v1016_v52 = vrot.slane %v991_v28, 6 }
 0x210   :  { %v971_v53 = vadd.f32 %v963_v24, %v1754_v10  ;;  %v994_v58 = vadd.f32 %v978_v7, %v969_v20  ;;  %v1015_v59 = vsel %vm263_vm9, %v1014_v47, %v989_v46  ;;  %v1018_v62 = vrot.slane %v992_v23, 5 }
 0x211   :  { %v995_v54 = vadd.f32 %v979_v45, %v970_v37  ;;  %v1017_v60 = vsel %vm266_vm10, %v1016_v52, %v1015_v59  ;;  %v1020_v38 = vrot.slane %v993_v12, 4 }
 0x212   :  { %v996_v33 = vadd.f32 %v980_v48, %v971_v53  ;;  %v1019_v30 = vsel %vm269_vm11, %v1018_v62, %v1017_v60  ;;  %v1022_v0 = vrot.slane %v994_v58, 3 }
 0x213   :  { %v1021_v49 = vsel %vm272_vm12, %v1020_v38, %v1019_v30  ;;  %v1024_v1 = vrot.slane %v995_v54, 2 }
 0x214   :  { %v1023_v8 = vsel %vm275_vm13, %v1022_v0, %v1021_v49  ;;  %v1026_v9 = vrot.slane %v996_v33, 1 }
 0x215   :  { %v1025_v11 = vsel %vm278_vm14, %v1024_v1, %v1023_v8 }
 0x216   :  { %v1027_v18 = vsel %vm281_vm15, %v1026_v9, %v1025_v11 }
 0x217   :  { %v1947_v21 = vsel %vm1005_vm5, %v1027_v18, %v1911_v15 }
 0x218   :  { %v1032_v34 = vrot.slane %v1947_v21, 4 }
 0x21a   :  { %v1033_v25 = vmax.f32 %v1947_v21, %v1032_v34 }
 0x21c   :  { %v1034_v13 = vrot.slane %v1033_v25, 2 }
 0x21e   :  { %v1035_v14 = vmax.f32 %v1033_v25, %v1034_v13 }
 0x220   :  { %v1036_v41 = vrot.slane %v1035_v14, 1 }
 0x222   :  { %v1951_v40 = vmax.f32 %v1035_v14, %v1036_v41 }
 0x224   :  { %v1038_v31 = vsub.f32 %v1947_v21, %v1951_v40 }
 0x226   :  { %v1039_v7 = vmul.f32 1.442695, %v1038_v31 }
 0x228   :  { %1492 = vpow2.f32 %v1039_v7 }
 0x232   :  { %v1493_v5 = vpop.eup %1492 }
 0x233   :  { %v1041_v16 = vmul.f32 %v1493_v5, %v1692_v51  ;;  %v1042_v15 = vmul.f32 %v1493_v5, %v1690_v50  ;;  %v1043_v27 = vmul.f32 %v1493_v5, %v1696_v56  ;;  %v1044_v45 = vmul.f32 %v1493_v5, %v1698_v57 }
 0x234   :  { %v1045_v19 = vmul.f32 %v1493_v5, %v1702_v2  ;;  %v1046_v29 = vmul.f32 %v1493_v5, %v1704_v3  ;;  %v1047_v4 = vmul.f32 %v1493_v5, %v1708_v17  ;;  %v1048_v22 = vmul.f32 %v1493_v5, %v1710_v26 }
 0x235   :  { %v1049_v46 = vrot.slane %v1041_v16, 4  ;;  %v1055_v28 = vrot.slane %v1042_v15, 4  ;;  %v1061_v24 = vrot.slane %v1043_v27, 4  ;;  %v1067_v20 = vrot.slane %v1044_v45, 4 }
 0x236   :  { %v1073_v23 = vrot.slane %v1045_v19, 4  ;;  %v1079_v47 = vrot.slane %v1046_v29, 4  ;;  %v1085_v37 = vrot.slane %v1047_v4, 4  ;;  %v1091_v48 = vrot.slane %v1048_v22, 4 }
 0x237   :  { %v1050_v12 = vadd.f32 %v1049_v46, %v1041_v16  ;;  %v1056_v52 = vadd.f32 %v1055_v28, %v1042_v15  ;;  %v1062_v53 = vadd.f32 %v1061_v24, %v1043_v27  ;;  %v1068_v58 = vadd.f32 %v1067_v20, %v1044_v45 }
 0x238   :  { %v1074_v59 = vadd.f32 %v1073_v23, %v1045_v19  ;;  %v1080_v62 = vadd.f32 %v1079_v47, %v1046_v29  ;;  %v1086_v54 = vadd.f32 %v1085_v37, %v1047_v4  ;;  %v1092_v60 = vadd.f32 %v1091_v48, %v1048_v22  ;;  %v1031_v47 = vld [vmem:[#allocation5 + $0x30] sm:$0xff] }
 0x239   :  { %v1051_v38 = vrot.slane %v1050_v12, 2  ;;  %v1057_v33 = vrot.slane %v1056_v52, 2  ;;  %v1063_v30 = vrot.slane %v1062_v53, 2  ;;  %v1069_v0 = vrot.slane %v1068_v58, 2 }
 0x23a   :  { %v1075_v49 = vrot.slane %v1074_v59, 2  ;;  %v1081_v1 = vrot.slane %v1080_v62, 2  ;;  %v1087_v63 = vrot.slane %v1086_v54, 2  ;;  %v1093_v8 = vrot.slane %v1092_v60, 2 }
 0x23b   :  { %v1052_v9 = vadd.f32 %v1051_v38, %v1050_v12  ;;  %v1058_v11 = vadd.f32 %v1057_v33, %v1056_v52  ;;  %v1064_v18 = vadd.f32 %v1063_v30, %v1062_v53  ;;  %v1070_v34 = vadd.f32 %v1069_v0, %v1068_v58 }
 0x23c   :  { %v1076_v25 = vadd.f32 %v1075_v49, %v1074_v59  ;;  %v1082_v13 = vadd.f32 %v1081_v1, %v1080_v62  ;;  %v1088_v14 = vadd.f32 %v1087_v63, %v1086_v54  ;;  %v1094_v41 = vadd.f32 %v1093_v8, %v1092_v60 }
 0x23d   :  { %v1053_v31 = vrot.slane %v1052_v9, 1  ;;  %v1059_v7 = vrot.slane %v1058_v11, 1  ;;  %v1065_v5 = vrot.slane %v1064_v18, 1  ;;  %v1071_v16 = vrot.slane %v1070_v34, 1 }
 0x23e   :  { %v1077_v15 = vrot.slane %v1076_v25, 1  ;;  %v1083_v27 = vrot.slane %v1082_v13, 1  ;;  %v1089_v4 = vrot.slane %v1088_v14, 1  ;;  %v1095_v46 = vrot.slane %v1094_v41, 1 }
 0x23f   :  { %v1054_v45 = vadd.f32 %v1053_v31, %v1052_v9  ;;  %v1060_v19 = vadd.f32 %v1059_v7, %v1058_v11  ;;  %v1066_v29 = vadd.f32 %v1065_v5, %v1064_v18  ;;  %v1072_v22 = vadd.f32 %v1071_v16, %v1070_v34 }
 0x240   :  { %v1078_v28 = vadd.f32 %v1077_v15, %v1076_v25  ;;  %v1084_v24 = vadd.f32 %v1083_v27, %v1082_v13  ;;  %v1090_v20 = vadd.f32 %v1089_v4, %v1088_v14  ;;  %v1096_v23 = vadd.f32 %v1095_v46, %v1094_v41 }
 0x241   :  { %1494 = vlog2.f32 %v1054_v45  ;;  %v1121_v37 = vadd.f32 %v1951_v40, %v1031_v47 }
 0x242   :  { %1496 = vlog2.f32 %v1060_v19 }
 0x243   :  { %1498 = vlog2.f32 %v1066_v29  ;;  %v1123_v60 = vrot.slane %v1121_v37, 1  ;;  %v1124_v0 = vrot.slane %v1121_v37, 2  ;;  %v1125_v49 = vrot.slane %v1121_v37, 3 }
 0x244   :  { %1500 = vlog2.f32 %v1072_v22  ;;  %v1126_v8 = vrot.slane %v1121_v37, 4  ;;  %v1127_v9 = vrot.slane %v1121_v37, 5  ;;  %v1128_v25 = vrot.slane %v1121_v37, 6 }
 0x245   :  { %1502 = vlog2.f32 %v1078_v28  ;;  %v1129_v29 = vrot.slane %v1121_v37, 7 }
 0x246   :  { %1504 = vlog2.f32 %v1084_v24 }
 0x247   :  { %1506 = vlog2.f32 %v1090_v20 }
 0x248   :  { %1508 = vlog2.f32 %v1096_v23 }
 0x24b   :  { %v1495_v48 = vpop.eup %1494 }
 0x24c   :  { %v1497_v12 = vpop.eup %1496  ;;  %v1098_v52 = vmul.f32 0.6931472, %v1495_v48 }
 0x24d   :  { %v1499_v53 = vpop.eup %1498  ;;  %v1100_v58 = vmul.f32 0.6931472, %v1497_v12 }
 0x24e   :  { %v1501_v59 = vpop.eup %1500  ;;  %v1102_v62 = vmul.f32 0.6931472, %v1499_v53  ;;  %v1113_v54 = vadd.f32 %v1098_v52, %v1719_v39 }
 0x24f   :  { %v1503_v38 = vpop.eup %1502  ;;  %v1104_v33 = vmul.f32 0.6931472, %v1501_v59  ;;  %v1114_v30 = vadd.f32 %v1100_v58, %v1722_v42 }
 0x250   :  { %v1505_v1 = vpop.eup %1504  ;;  %v1106_v63 = vmul.f32 0.6931472, %v1503_v38  ;;  %v1115_v40 = vadd.f32 %v1102_v62, %v1725_v43  ;;  %v1138_v7 = vadd.f32 %v1121_v37, %v1113_v54  ;;  %v2044_v37 = vrot.slane %v1669_v32, %v1641_v6 }
 0x251   :  { %v1507_v11 = vpop.eup %1506  ;;  %v1108_v18 = vmul.f32 0.6931472, %v1505_v1  ;;  %v1116_v34 = vadd.f32 %v1104_v33, %v1728_v44  ;;  %v1139_v13 = vadd.f32 %v1123_v60, %v1114_v30 }
 0x252   :  { %v1509_v14 = vpop.eup %1508  ;;  %v1110_v41 = vmul.f32 0.6931472, %v1507_v11  ;;  %v1117_v31 = vadd.f32 %v1106_v63, %v1736_v55  ;;  %v1140_v5 = vadd.f32 %v1124_v0, %v1115_v40  ;;  %vm1154_vm6 = vcmp.eq.s32.totalorder %v2044_v37, 1 }
 0x253   :  { %v1112_v16 = vmul.f32 0.6931472, %v1509_v14  ;;  %v1118_v15 = vadd.f32 %v1108_v18, %v1741_v61  ;;  %v1141_v27 = vadd.f32 %v1125_v49, %v1116_v34  ;;  %v1163_v45 = vrot.slane %v1139_v13, 7 }
 0x254   :  { %v1119_v19 = vadd.f32 %v1110_v41, %v1750_v36  ;;  %v1142_v4 = vadd.f32 %v1126_v8, %v1117_v31  ;;  %v1165_v22 = vrot.slane %v1140_v5, 6 }
 0x255   :  { %v1120_v46 = vadd.f32 %v1112_v16, %v1754_v10  ;;  %v1143_v28 = vadd.f32 %v1127_v9, %v1118_v15  ;;  %v1164_v24 = vsel %vm263_vm9, %v1163_v45, %v1138_v7  ;;  %v1167_v20 = vrot.slane %v1141_v27, 5 }
 0x256   :  { %v1144_v23 = vadd.f32 %v1128_v25, %v1119_v19  ;;  %v1166_v47 = vsel %vm266_vm10, %v1165_v22, %v1164_v24  ;;  %v1169_v48 = vrot.slane %v1142_v4, 4 }
 0x257   :  { %v1145_v12 = vadd.f32 %v1129_v29, %v1120_v46  ;;  %v1168_v52 = vsel %vm269_vm11, %v1167_v20, %v1166_v47  ;;  %v1171_v53 = vrot.slane %v1143_v28, 3 }
 0x258   :  { %v1170_v58 = vsel %vm272_vm12, %v1169_v48, %v1168_v52  ;;  %v1173_v59 = vrot.slane %v1144_v23, 2 }
 0x259   :  { %v1172_v62 = vsel %vm275_vm13, %v1171_v53, %v1170_v58  ;;  %v1175_v54 = vrot.slane %v1145_v12, 1 }
 0x25a   :  { %v1174_v60 = vsel %vm278_vm14, %v1173_v59, %v1172_v62 }
 0x25b   :  { %v1176_v38 = vsel %vm281_vm15, %v1175_v54, %v1174_v60 }
 0x25c   :  { %v1983_v33 = vsel %vm1154_vm6, %v1176_v38, %v1947_v21 }
 0x25d   :  { %v1181_v30 = vrot.slane %v1983_v33, 4 }
 0x25f   :  { %v1182_v0 = vmax.f32 %v1983_v33, %v1181_v30 }
 0x261   :  { %v1183_v49 = vrot.slane %v1182_v0, 2 }
 0x263   :  { %v1184_v1 = vmax.f32 %v1182_v0, %v1183_v49 }
 0x265   :  { %v1185_v63 = vrot.slane %v1184_v1, 1 }
 0x267   :  { %v1987_v40 = vmax.f32 %v1184_v1, %v1185_v63 }
 0x269   :  { %v1187_v32 = vsub.f32 %v1983_v33, %v1987_v40 }
 0x26b   :  { %v1188_v8 = vmul.f32 1.442695, %v1187_v32 }
 0x26d   :  { %1510 = vpow2.f32 %v1188_v8 }
 0x277   :  { %v1511_v9 = vpop.eup %1510 }
 0x278   :  { %v1190_v11 = vmul.f32 %v1511_v9, %v1692_v51  ;;  %v1191_v21 = vmul.f32 %v1511_v9, %v1690_v50  ;;  %v1192_v18 = vmul.f32 %v1511_v9, %v1696_v56  ;;  %v1193_v34 = vmul.f32 %v1511_v9, %v1698_v57 }
 0x279   :  { %v1194_v25 = vmul.f32 %v1511_v9, %v1702_v2  ;;  %v1195_v13 = vmul.f32 %v1511_v9, %v1704_v3  ;;  %v1196_v14 = vmul.f32 %v1511_v9, %v1708_v17  ;;  %v1197_v41 = vmul.f32 %v1511_v9, %v1710_v26 }
 0x27a   :  { %v1198_v31 = vrot.slane %v1190_v11, 4  ;;  %v1204_v7 = vrot.slane %v1191_v21, 4  ;;  %v1210_v5 = vrot.slane %v1192_v18, 4  ;;  %v1216_v16 = vrot.slane %v1193_v34, 4 }
 0x27b   :  { %v1222_v15 = vrot.slane %v1194_v25, 4  ;;  %v1228_v51 = vrot.slane %v1195_v13, 4  ;;  %v1234_v27 = vrot.slane %v1196_v14, 4  ;;  %v1240_v50 = vrot.slane %v1197_v41, 4 }
 0x27c   :  { %v1199_v45 = vadd.f32 %v1198_v31, %v1190_v11  ;;  %v1205_v56 = vadd.f32 %v1204_v7, %v1191_v21  ;;  %v1211_v19 = vadd.f32 %v1210_v5, %v1192_v18  ;;  %v1217_v57 = vadd.f32 %v1216_v16, %v1193_v34 }
 0x27d   :  { %v1223_v29 = vadd.f32 %v1222_v15, %v1194_v25  ;;  %v1229_v2 = vadd.f32 %v1228_v51, %v1195_v13  ;;  %v1235_v4 = vadd.f32 %v1234_v27, %v1196_v14  ;;  %v1241_v3 = vadd.f32 %v1240_v50, %v1197_v41  ;;  %v1180_v25 = vld [vmem:[#allocation5 + $0x38] sm:$0xff] }
 0x27e   :  { %v1200_v22 = vrot.slane %v1199_v45, 2  ;;  %v1206_v17 = vrot.slane %v1205_v56, 2  ;;  %v1212_v46 = vrot.slane %v1211_v19, 2  ;;  %v1218_v26 = vrot.slane %v1217_v57, 2 }
 0x27f   :  { %v1224_v28 = vrot.slane %v1223_v29, 2  ;;  %v1230_v24 = vrot.slane %v1229_v2, 2  ;;  %v1236_v20 = vrot.slane %v1235_v4, 2  ;;  %v1242_v23 = vrot.slane %v1241_v3, 2 }
 0x280   :  { %v1201_v47 = vadd.f32 %v1200_v22, %v1199_v45  ;;  %v1207_v48 = vadd.f32 %v1206_v17, %v1205_v56  ;;  %v1213_v12 = vadd.f32 %v1212_v46, %v1211_v19  ;;  %v1219_v52 = vadd.f32 %v1218_v26, %v1217_v57 }
 0x281   :  { %v1225_v53 = vadd.f32 %v1224_v28, %v1223_v29  ;;  %v1231_v58 = vadd.f32 %v1230_v24, %v1229_v2  ;;  %v1237_v59 = vadd.f32 %v1236_v20, %v1235_v4  ;;  %v1243_v37 = vadd.f32 %v1242_v23, %v1241_v3 }
 0x282   :  { %v1202_v62 = vrot.slane %v1201_v47, 1  ;;  %v1208_v54 = vrot.slane %v1207_v48, 1  ;;  %v1214_v60 = vrot.slane %v1213_v12, 1  ;;  %v1220_v38 = vrot.slane %v1219_v52, 1 }
 0x283   :  { %v1226_v30 = vrot.slane %v1225_v53, 1  ;;  %v1232_v0 = vrot.slane %v1231_v58, 1  ;;  %v1238_v32 = vrot.slane %v1237_v59, 1  ;;  %v1244_v9 = vrot.slane %v1243_v37, 1 }
 0x284   :  { %v1203_v49 = vadd.f32 %v1202_v62, %v1201_v47  ;;  %v1209_v1 = vadd.f32 %v1208_v54, %v1207_v48  ;;  %v1215_v63 = vadd.f32 %v1214_v60, %v1213_v12  ;;  %v1221_v8 = vadd.f32 %v1220_v38, %v1219_v52 }
 0x285   :  { %v1227_v11 = vadd.f32 %v1226_v30, %v1225_v53  ;;  %v1233_v21 = vadd.f32 %v1232_v0, %v1231_v58  ;;  %v1239_v18 = vadd.f32 %v1238_v32, %v1237_v59  ;;  %v1245_v34 = vadd.f32 %v1244_v9, %v1243_v37 }
 0x286   :  { %1512 = vlog2.f32 %v1203_v49  ;;  %v1270_v13 = vadd.f32 %v1987_v40, %v1180_v25 }
 0x287   :  { %1514 = vlog2.f32 %v1209_v1  ;;  %v2045_v1 = vrot.slane %v1675_v35, %v1641_v6 }
 0x288   :  { %1516 = vlog2.f32 %v1215_v63  ;;  %v1272_v27 = vrot.slane %v1270_v13, 1  ;;  %v1273_v19 = vrot.slane %v1270_v13, 2  ;;  %v1274_v57 = vrot.slane %v1270_v13, 3 }
 0x289   :  { %1518 = vlog2.f32 %v1221_v8  ;;  %v1275_v4 = vrot.slane %v1270_v13, 4  ;;  %v1276_v3 = vrot.slane %v1270_v13, 5  ;;  %v1277_v26 = vrot.slane %v1270_v13, 6 }
 0x28a   :  { %1520 = vlog2.f32 %v1227_v11  ;;  %v1278_v53 = vrot.slane %v1270_v13, 7  ;;  %vm1303_vm7 = vcmp.eq.s32.totalorder %v2045_v1, 1 }
 0x28b   :  { %1522 = vlog2.f32 %v1233_v21 }
 0x28c   :  { %1524 = vlog2.f32 %v1239_v18 }
 0x28d   :  { %1526 = vlog2.f32 %v1245_v34 }
 0x290   :  { %v1513_v14 = vpop.eup %1512 }
 0x291   :  { %v1515_v41 = vpop.eup %1514  ;;  %v1247_v31 = vmul.f32 0.6931472, %v1513_v14 }
 0x292   :  { %v1517_v7 = vpop.eup %1516  ;;  %v1249_v5 = vmul.f32 0.6931472, %v1515_v41 }
 0x293   :  { %v1519_v16 = vpop.eup %1518  ;;  %v1251_v15 = vmul.f32 0.6931472, %v1517_v7  ;;  %v1262_v51 = vadd.f32 %v1247_v31, %v1719_v39 }
 0x294   :  { %v1521_v50 = vpop.eup %1520  ;;  %v1253_v45 = vmul.f32 0.6931472, %v1519_v16  ;;  %v1263_v56 = vadd.f32 %v1249_v5, %v1722_v42 }
 0x295   :  { %v1523_v29 = vpop.eup %1522  ;;  %v1255_v2 = vmul.f32 0.6931472, %v1521_v50  ;;  %v1264_v40 = vadd.f32 %v1251_v15, %v1725_v43  ;;  %v1287_v23 = vadd.f32 %v1270_v13, %v1262_v51 }
 0x296   :  { %v1525_v22 = vpop.eup %1524  ;;  %v1257_v17 = vmul.f32 0.6931472, %v1523_v29  ;;  %v1265_v46 = vadd.f32 %v1253_v45, %v1728_v44  ;;  %v1288_v28 = vadd.f32 %v1272_v27, %v1263_v56 }
 0x297   :  { %v1527_v39 = vpop.eup %1526  ;;  %v1259_v24 = vmul.f32 0.6931472, %v1525_v22  ;;  %v1266_v20 = vadd.f32 %v1255_v2, %v1736_v55  ;;  %v1289_v42 = vadd.f32 %v1273_v19, %v1264_v40 }
 0x298   :  { %v1261_v47 = vmul.f32 0.6931472, %v1527_v39  ;;  %v1267_v48 = vadd.f32 %v1257_v17, %v1741_v61  ;;  %v1290_v12 = vadd.f32 %v1274_v57, %v1265_v46  ;;  %v1312_v52 = vrot.slane %v1288_v28, 7 }
 0x299   :  { %v1268_v43 = vadd.f32 %v1259_v24, %v1750_v36  ;;  %v1291_v58 = vadd.f32 %v1275_v4, %v1266_v20  ;;  %v1314_v59 = vrot.slane %v1289_v42, 6 }
 0x29a   :  { %v1269_v44 = vadd.f32 %v1261_v47, %v1754_v10  ;;  %v1292_v37 = vadd.f32 %v1276_v3, %v1267_v48  ;;  %v1313_v62 = vsel %vm263_vm9, %v1312_v52, %v1287_v23  ;;  %v1316_v54 = vrot.slane %v1290_v12, 5 }
 0x29b   :  { %v1293_v60 = vadd.f32 %v1277_v26, %v1268_v43  ;;  %v1315_v55 = vsel %vm266_vm10, %v1314_v59, %v1313_v62  ;;  %v1318_v38 = vrot.slane %v1291_v58, 4 }
 0x29c   :  { %v1294_v30 = vadd.f32 %v1278_v53, %v1269_v44  ;;  %v1317_v61 = vsel %vm269_vm11, %v1316_v54, %v1315_v55  ;;  %v1320_v0 = vrot.slane %v1292_v37, 3 }
 0x29d   :  { %v1319_v49 = vsel %vm272_vm12, %v1318_v38, %v1317_v61  ;;  %v1322_v36 = vrot.slane %v1293_v60, 2 }
 0x29e   :  { %v1321_v10 = vsel %vm275_vm13, %v1320_v0, %v1319_v49  ;;  %v1324_v63 = vrot.slane %v1294_v30, 1 }
 0x29f   :  { %v1323_v32 = vsel %vm278_vm14, %v1322_v36, %v1321_v10 }
 0x2a0   :  { %v1325_v8 = vsel %vm281_vm15, %v1324_v63, %v1323_v32 }
 0x2a1   :  { %v1327_v9 = vsel %vm1303_vm7, %v1325_v8, %v1983_v33 }
 0x2a2   :  { %1328 = vst [vmem:[#allocation2] sm:$0xff] %v1327_v9 }
 0x2a3 PF:  { %v1333_v11 = vld [vmem:[%s2039_s5] sm:$0xff]  ;;  %v1586_v21 = vmov 0   ;;  %s1587_s5 = smov [#allocation8]  }
 0x2a4   :  { %1528 = vset.pattern.permute.xlu0 %v1586_v21  ;;  %s1365_s16 = sshll.u32 %s1587_s5, 4  ;;  %s1366_s16 = int_to_ptr.vmem [resolvable:$true] %s1365_s16 }
 0x2a5   :  { %1336 = vperm.xlu0 %1528, %v1333_v11   ;;  %s1555_s17 = scalar_lea.vmem %s1366_s16, 16  ;;  %s1559_s18 = scalar_lea.vmem %s1366_s16, 32 }
 0x2a6   :  { %p1556_p9 = scmp.ne.s32.totalorder %s1366_s16, %s1555_s17  ;;  %p1560_p10 = scmp.lt.s32.totalorder %s1366_s16, %s1366_s16 }
 0x2a7   :  { %p1561_p11 = scmp.lt.s32.totalorder %s1559_s18, %s1555_s17 }
 0x2a9   :  { %v1332_v6 = vld [vmem:[#allocation2] sm:$0xff]  ;;  %p1562_p12 = por %p1561_p11, %p1560_p10 }
 0x2ab   :  { %p1563_p13 = pnand %p1562_p12, %p1556_p9 }
 0x324   :  { %v1337_v35 = vpop.permute.xlu0 %1336 }
 0x325   :  { %v1339_v18 = vadd.f32 %v1337_v35, %v1332_v6 }
 0x327   :  { %v1340_v34 = vrot.slane %v1339_v18, 4 }
 0x329   :  { %v1341_v25 = vmax.f32 %v1339_v18, %v1340_v34 }
 0x32b   :  { %v1342_v13 = vrot.slane %v1341_v25, 2 }
 0x32d   :  { %v1343_v14 = vmax.f32 %v1341_v25, %v1342_v13 }
 0x32f   :  { %v1344_v41 = vrot.slane %v1343_v14, 1 }
 0x331   :  { %v1345_v31 = vmax.f32 %v1343_v14, %v1344_v41 }
 0x333   :  { %v1346_v7 = vsub.f32 %v1339_v18, %v1345_v31 }
 0x335   :  { %v1347_v33 = vmul.f32 1.442695, %v1346_v7 }
 0x337   :  { %1529 = vpow2.f32 %v1347_v33 }
 0x341   :  { %v1530_v5 = vpop.eup %1529 }
 0x342   :  { %v1349_v16 = vrot.slane %v1530_v5, 4 }
 0x344   :  { %v1350_v15 = vadd.f32 %v1530_v5, %v1349_v16 }
 0x346   :  { %v1351_v51 = vrot.slane %v1350_v15, 2 }
 0x348   :  { %v1352_v27 = vadd.f32 %v1351_v51, %v1350_v15 }
 0x34a   :  { %v1353_v50 = vrot.slane %v1352_v27, 1 }
 0x34c   :  { %v1354_v45 = vadd.f32 %v1353_v50, %v1352_v27 }
 0x34e   :  { %1531 = vlog2.f32 %v1354_v45 }
 0x358   :  { %v1532_v56 = vpop.eup %1531 }
 0x359   :  { %v1356_v19 = vmul.f32 0.6931472, %v1532_v56 }
 0x35b   :  { %v1357_v57 = vadd.f32 %v1356_v19, %v1345_v31 }
 0x35d   :  { %1358 = vst [vmem:[#allocation8] sm:$0x1] %v1357_v57 }
 0x35e   :  { %1566 = shalt.err (!%p1563_p13)
}
 0x35f   :  { %s1567_s21 = scalar_lea.hbm %s2040_s6, 16 }
 0x360   :  { %p1568_p0 = scmp.ne.s32.totalorder %s2040_s6, %s1567_s21  ;;  %p1571_p1 = scmp.lt.u32.totalorder %s1567_s21, %s2040_s6 }
 0x362   :  { %p1573_p2 = pnand %p1571_p1, %p1568_p0 }
 0x364   :  { %1576 = shalt.err (!%p1573_p2)
}
 0x365   :  { %1368 = dma.vmem_to_hbm [thread:$0]  %s1366_s16, 16, %s2040_s6, [#allocation7]  }
 0x366   :  { %1579 = dma.done.wait [#allocation7], 16  }
 0x367   :  { %1580 = vsyncadd [#allocation7], 4294967280 }
 0x368   :  { %1372 = vsyncpa [#allocation6], 1 }
 0x369   :  { %1373 = vsyncpa [#allocation7], 1 }

</bundles_post_ra>
